<compile_context>
chip_gen: v5e
topology: v5e:2x2
jax: 0.10.0
libtpu: 0.0.40
codegen_flags: <defaults>
</compile_context>

<pallas_src>
import functools

import jax
import jax.numpy as jnp
from jax.experimental import pallas as pl
from jax.experimental.pallas import tpu as pltpu

_VMEM_LIMIT = 48 * 1024 * 1024  # explicit scoped-VMEM budget (fits v5e/v6e/v7x)


def _largest_divisor_tile(n, cap):
    t = min(n, cap)
    while n % t:
        t -= 1
    return t


# ------------------------------ shared helpers ------------------------------
def _layer_norm_f32(x, gamma, beta, eps=1e-6):
    mean = jnp.mean(x, axis=-1, keepdims=True)
    var = jnp.mean(jnp.square(x - mean), axis=-1, keepdims=True)
    return (x - mean) * jax.lax.rsqrt(var + eps) * gamma + beta


def _multi_head_attention(q, kv, mask, wo, n_heads, scale, attn_ref=None):
    """q: (tq, H) f32, kv: (Sk, 2H) f32, mask: (tq, Sk) int.
    Returns (tq, H) f32 attention output projected through wo (bias excluded).
    Optionally writes exact softmax probabilities to attn_ref (n_heads, tq, Sk)."""
    tq, h_dim = q.shape
    d = h_dim // n_heads
    # hoisted additive mask bias + single bf16 casts (not per head)
    bias = jnp.where(mask == 0, jnp.float32(-1e9), jnp.float32(0.0))
    q_b = q.astype(jnp.bfloat16)
    k_b = kv[:, :h_dim].astype(jnp.bfloat16)
    v_b = kv[:, h_dim:].astype(jnp.bfloat16)
    ctxs = []
    for h in range(n_heads):                         # small static unroll
        lo, hi = h * d, (h + 1) * d
        s = jnp.dot(q_b[:, lo:hi], k_b[:, lo:hi].T,
                    preferred_element_type=jnp.float32) * scale + bias
        s = s - jnp.max(s, axis=-1, keepdims=True)
        p = jnp.exp(s)
        p = p / jnp.sum(p, axis=-1, keepdims=True)   # exact softmax (map is returned)
        if attn_ref is not None:
            attn_ref[h] = p.astype(attn_ref.dtype)
        ctxs.append(jnp.dot(p.astype(jnp.bfloat16), v_b[:, lo:hi],
                            preferred_element_type=jnp.float32))
    # concat heads back to (tq, H) and do ONE full-contraction output projection
    ctx = jnp.concatenate(ctxs, axis=-1).astype(jnp.bfloat16)
    return jnp.dot(ctx, wo, preferred_element_type=jnp.float32)


# ------------------- kernel 1: LN + self-attention + residual -----------------
def self_attn_kernel(xq_ref, xkv_ref, m_ref, g_ref, be_ref,
                     wq_ref, bq_ref, wkv_ref, bkv_ref, wo_ref, bo_ref,
                     o_ref, *, n_heads, scale):
    g, be = g_ref[...], be_ref[...]
    xq = xq_ref[...].astype(jnp.float32)                    # (tq, H) query rows
    xkv = xkv_ref[...].astype(jnp.float32)                  # (S, H) key/value rows
    xn_q = _layer_norm_f32(xq, g, be).astype(jnp.bfloat16)
    xn_kv = _layer_norm_f32(xkv, g, be).astype(jnp.bfloat16)
    q = jnp.dot(xn_q, wq_ref[...], preferred_element_type=jnp.float32) + bq_ref[...]
    kv = jnp.dot(xn_kv, wkv_ref[...], preferred_element_type=jnp.float32) + bkv_ref[...]
    attn = _multi_head_attention(q, kv, m_ref[...], wo_ref[...], n_heads, scale)
    o_ref[...] = (xq + attn + bo_ref[...]).astype(o_ref.dtype)


def self_attention_block(x, mask, params, n_heads, *, q_tile=256):
    B, S, H = x.shape
    scale = 1.0 / ((H // n_heads) ** 0.5)
    tq = _largest_divisor_tile(S, q_tile)
    wkv = jnp.concatenate([params["self_wk"], params["self_wv"]], axis=1)
    bkv = jnp.concatenate([params["self_bk"], params["self_bv"]], axis=1)
    kernel = functools.partial(self_attn_kernel, n_heads=n_heads, scale=scale)

    def w_spec(shape):
        return pl.BlockSpec(shape, lambda b, qi: (0,) * len(shape))

    return pl.pallas_call(
        kernel,
        out_shape=jax.ShapeDtypeStruct((B, S, H), x.dtype),
        grid=(B, S // tq),
        in_specs=[
            pl.BlockSpec((None, tq, H), lambda b, qi: (b, qi, 0)),      # query rows
            pl.BlockSpec((None, S, H), lambda b, qi: (b, 0, 0)),        # key/value rows
            pl.BlockSpec((None, None, tq, S), lambda b, qi: (b, 0, qi, 0)),
            w_spec((1, H)), w_spec((1, H)),              # gamma, beta
            w_spec((H, H)), w_spec((1, H)),              # wq, bq
            w_spec((H, 2 * H)), w_spec((1, 2 * H)),      # wkv, bkv (fused)
            w_spec((H, H)), w_spec((1, H)),              # wo, bo
        ],
        out_specs=pl.BlockSpec((None, tq, H), lambda b, qi: (b, qi, 0)),
        compiler_params=pltpu.CompilerParams(
            dimension_semantics=("parallel", "parallel"),
            vmem_limit_bytes=_VMEM_LIMIT),
    )(x, x, mask, params["ln_gamma"], params["ln_beta"],
      params["self_wq"], params["self_bq"], wkv, bkv,
      params["self_wo"], params["self_bo"])


# ---------------- kernel 2: LN + cross-attention + residual (+map) ------------
def cross_attn_kernel(xq_ref, e_ref, m_ref, g_ref, be_ref,
                      wq_ref, bq_ref, wkv_ref, bkv_ref, wo_ref, bo_ref,
                      o_ref, attn_ref, *, n_heads, scale):
    g, be = g_ref[...], be_ref[...]
    xq = xq_ref[...].astype(jnp.float32)                    # (tq, H)
    xn_q = _layer_norm_f32(xq, g, be).astype(jnp.bfloat16)
    e = e_ref[...].astype(jnp.bfloat16)                     # (Sk, H) encoder output
    q = jnp.dot(xn_q, wq_ref[...], preferred_element_type=jnp.float32) + bq_ref[...]
    kv = jnp.dot(e, wkv_ref[...], preferred_element_type=jnp.float32) + bkv_ref[...]
    attn = _multi_head_attention(q, kv, m_ref[...], wo_ref[...],
                                 n_heads, scale, attn_ref)
    o_ref[...] = (xq + attn + bo_ref[...]).astype(o_ref.dtype)


def cross_attention_block(x, enc, mask, params, n_heads, *, q_tile=256):
    B, Sq, H = x.shape
    Sk = enc.shape[1]
    scale = 1.0 / ((H // n_heads) ** 0.5)
    tq = _largest_divisor_tile(Sq, q_tile)
    wkv = jnp.concatenate([params["enc_wk"], params["enc_wv"]], axis=1)
    bkv = jnp.concatenate([params["enc_bk"], params["enc_bv"]], axis=1)
    kernel = functools.partial(cross_attn_kernel, n_heads=n_heads, scale=scale)

    def w_spec(shape):
        return pl.BlockSpec(shape, lambda b, qi: (0,) * len(shape))

    out, attn = pl.pallas_call(
        kernel,
        out_shape=(jax.ShapeDtypeStruct((B, Sq, H), x.dtype),
                   jax.ShapeDtypeStruct((B, n_heads, Sq, Sk), jnp.float32)),
        grid=(B, Sq // tq),
        in_specs=[
            pl.BlockSpec((None, tq, H), lambda b, qi: (b, qi, 0)),
            pl.BlockSpec((None, Sk, H), lambda b, qi: (b, 0, 0)),
            pl.BlockSpec((None, None, tq, Sk), lambda b, qi: (b, 0, qi, 0)),
            w_spec((1, H)), w_spec((1, H)),              # gamma, beta
            w_spec((H, H)), w_spec((1, H)),              # wq, bq
            w_spec((H, 2 * H)), w_spec((1, 2 * H)),      # wkv, bkv (fused)
            w_spec((H, H)), w_spec((1, H)),              # wo, bo
        ],
        out_specs=(pl.BlockSpec((None, tq, H), lambda b, qi: (b, qi, 0)),
                   pl.BlockSpec((None, n_heads, tq, Sk), lambda b, qi: (b, 0, qi, 0))),
        compiler_params=pltpu.CompilerParams(
            dimension_semantics=("parallel", "parallel"),
            vmem_limit_bytes=_VMEM_LIMIT),
    )(x, enc, mask, params["ln_gamma"], params["ln_beta"],
      params["enc_wq"], params["enc_bq"], wkv, bkv,
      params["enc_wo"], params["enc_bo"])
    return out, attn


# ------------------------ kernel 3: LN + FFN + residual -----------------------
def ffn_kernel(x_ref, g_ref, be_ref, w1_ref, b1_ref, w2_ref, b2_ref, o_ref):
    x = x_ref[...].astype(jnp.float32)                      # (tm, H)
    xn = _layer_norm_f32(x, g_ref[...], be_ref[...]).astype(jnp.bfloat16)
    h = jnp.dot(xn, w1_ref[...], preferred_element_type=jnp.float32) + b1_ref[...]
    h = jnp.maximum(h, 0.0).astype(jnp.bfloat16)
    y = jnp.dot(h, w2_ref[...], preferred_element_type=jnp.float32) + b2_ref[...]
    o_ref[...] = (x + y).astype(o_ref.dtype)


def ffn_block(x, params, *, row_tile=512):
    B, S, H = x.shape
    M = B * S
    F = params["ffn_w1"].shape[1]
    tm = _largest_divisor_tile(M, row_tile)      # divisor of M, never asserts
    x2 = x.reshape(M, H)

    def w_spec(shape):
        return pl.BlockSpec(shape, lambda i: (0,) * len(shape))

    out = pl.pallas_call(
        ffn_kernel,
        out_shape=jax.ShapeDtypeStruct((M, H), x.dtype),
        grid=(M // tm,),
        in_specs=[
            pl.BlockSpec((tm, H), lambda i: (i, 0)),
            w_spec((1, H)), w_spec((1, H)),              # gamma, beta
            w_spec((H, F)), w_spec((1, F)),              # w1, b1
            w_spec((F, H)), w_spec((1, H)),              # w2, b2
        ],
        out_specs=pl.BlockSpec((tm, H), lambda i: (i, 0)),
        compiler_params=pltpu.CompilerParams(
            dimension_semantics=("parallel",),
            vmem_limit_bytes=_VMEM_LIMIT),
    )(x2, params["ln_gamma"], params["ln_beta"],
      params["ffn_w1"], params["ffn_b1"], params["ffn_w2"], params["ffn_b2"])
    return out.reshape(B, S, H)


# ------------------------------- decoder layer --------------------------------
def decoder_layer(target, encoder_output, target_mask, dec_enc_mask, params, n_heads):
    output = self_attention_block(target, target_mask, params, n_heads)
    output, attn_map = cross_attention_block(output, encoder_output, dec_enc_mask,
                                             params, n_heads)
    output = ffn_block(output, params)
    return output, attn_map


# ------------------------------ pure-JAX reference -----------------------------
def _ref_attention(xq, xkv, mask, params, prefix, n_heads):
    H = xq.shape[-1]
    d = H // n_heads
    scale = 1.0 / (d ** 0.5)

    def proj(a, w, b):
        return jnp.einsum("bsh,hf->bsf", a.astype(jnp.bfloat16), w,
                          preferred_element_type=jnp.float32) + b

    q = proj(xq, params[prefix + "_wq"], params[prefix + "_bq"])
    k = proj(xkv, params[prefix + "_wk"], params[prefix + "_bk"])
    v = proj(xkv, params[prefix + "_wv"], params[prefix + "_bv"])
    B, Sq, _ = q.shape
    Sk = k.shape[1]
    q = q.reshape(B, Sq, n_heads, d).transpose(0, 2, 1, 3)
    k = k.reshape(B, Sk, n_heads, d).transpose(0, 2, 1, 3)
    v = v.reshape(B, Sk, n_heads, d).transpose(0, 2, 1, 3)
    s = jnp.einsum("bhqd,bhkd->bhqk", q.astype(jnp.bfloat16), k.astype(jnp.bfloat16),
                   preferred_element_type=jnp.float32) * scale
    s = jnp.where(mask == 0, -1e9, s)
    p = jax.nn.softmax(s, axis=-1)
    ctx = jnp.einsum("bhqk,bhkd->bhqd", p.astype(jnp.bfloat16), v.astype(jnp.bfloat16),
                     preferred_element_type=jnp.float32)
    ctx = ctx.transpose(0, 2, 1, 3).reshape(B, Sq, H)
    out = jnp.einsum("bsh,hf->bsf", ctx.astype(jnp.bfloat16), params[prefix + "_wo"],
                     preferred_element_type=jnp.float32) + params[prefix + "_bo"]
    return out, p


def decoder_layer_ref(target, encoder_output, target_mask, dec_enc_mask, params, n_heads):
    def ln(a):
        return _layer_norm_f32(a, params["ln_gamma"], params["ln_beta"])

    sa, _ = _ref_attention(ln(target), ln(target), target_mask, params, "self", n_heads)
    output = target + sa
    ca, attn = _ref_attention(ln(output), encoder_output, dec_enc_mask, params, "enc", n_heads)
    output = output + ca
    xn = ln(output).astype(jnp.bfloat16)
    h = jnp.maximum(jnp.einsum("bsh,hf->bsf", xn, params["ffn_w1"],
                               preferred_element_type=jnp.float32) + params["ffn_b1"], 0.0)
    y = jnp.einsum("bsf,fh->bsh", h.astype(jnp.bfloat16), params["ffn_w2"],
                   preferred_element_type=jnp.float32) + params["ffn_b2"]
    return output + y, attn


# --------------------------------- parameters ----------------------------------
def init_params(key, hidden_dim, ffn_dim):
    keys = jax.random.split(key, 10)

    def lin(k, fan_in, fan_out):
        w = jax.random.normal(k, (fan_in, fan_out), jnp.float32) * (fan_in ** -0.5)
        return w.astype(jnp.bfloat16)          # bf16 weights feed the MXU directly

    p = {
        "ln_gamma": jnp.ones((1, hidden_dim), jnp.float32),
        "ln_beta": jnp.zeros((1, hidden_dim), jnp.float32),
        "ffn_w1": lin(keys[8], hidden_dim, ffn_dim),
        "ffn_b1": jnp.zeros((1, ffn_dim), jnp.float32),
        "ffn_w2": lin(keys[9], ffn_dim, hidden_dim),
        "ffn_b2": jnp.zeros((1, hidden_dim), jnp.float32),
    }
    for i, prefix in enumerate(["self", "enc"]):
        for j, n in enumerate(["q", "k", "v", "o"]):
            p[f"{prefix}_w{n}"] = lin(keys[i * 4 + j], hidden_dim, hidden_dim)
            p[f"{prefix}_b{n}"] = jnp.zeros((1, hidden_dim), jnp.float32)
    return p


if __name__ == "__main__":
    B, TGT_LEN, SRC_LEN = 2, 8, 16
    HIDDEN, N_HEADS, FFN = 32, 4, 64

    key = jax.random.PRNGKey(0)
    k_t, k_e, k_p = jax.random.split(key, 3)
    target = jax.random.normal(k_t, (B, TGT_LEN, HIDDEN), jnp.float32)
    encoder_output = jax.random.normal(k_e, (B, SRC_LEN, HIDDEN), jnp.float32)

    # causal self-attention mask and full cross-attention mask
    causal = jnp.tril(jnp.ones((TGT_LEN, TGT_LEN), jnp.int32))
    target_mask = jnp.broadcast_to(causal, (B, 1, TGT_LEN, TGT_LEN)).astype(jnp.int32)
    dec_enc_mask = jnp.ones((B, 1, TGT_LEN, SRC_LEN), jnp.int32)

    params = init_params(k_p, HIDDEN, FFN)

    fwd = jax.jit(lambda t, e, tm, dm: decoder_layer(t, e, tm, dm, params, N_HEADS))
    out, attn_map = fwd(target, encoder_output, target_mask, dec_enc_mask)
    out = jax.block_until_ready(out)
    attn_map = jax.block_until_ready(attn_map)

    assert out.shape == (B, TGT_LEN, HIDDEN)
    assert attn_map.shape == (B, N_HEADS, TGT_LEN, SRC_LEN)
    assert bool(jnp.all(jnp.isfinite(out)))
    # exact-softmax attention rows must sum to 1
    assert bool(jnp.allclose(jnp.sum(attn_map, axis=-1), 1.0, atol=1e-3))

    # cross-check against a pure-JAX reference (same bf16 matmul inputs)
    ref_out, ref_attn = decoder_layer_ref(target, encoder_output, target_mask,
                                          dec_enc_mask, params, N_HEADS)
    assert bool(jnp.allclose(out, ref_out, atol=5e-2, rtol=5e-2))
    assert bool(jnp.allclose(attn_map, ref_attn, atol=2e-2, rtol=2e-2))

    print("KERNEL_OK")
</pallas_src>

<mosaic_0001>
module attributes {stable_mosaic.version = 11 : i64} {
  func.func @cross_attn_kernel(%arg0: i32, %arg1: i32, %arg2: memref<1x8x32xf32, #tpu.memory_space<vmem>>, %arg3: memref<1x16x32xf32, #tpu.memory_space<vmem>>, %arg4: memref<1x1x8x16xi32, #tpu.memory_space<vmem>>, %arg5: memref<1x32xf32, #tpu.memory_space<vmem>>, %arg6: memref<1x32xf32, #tpu.memory_space<vmem>>, %arg7: memref<32x32xbf16, #tpu.memory_space<vmem>>, %arg8: memref<1x32xf32, #tpu.memory_space<vmem>>, %arg9: memref<32x64xbf16, #tpu.memory_space<vmem>>, %arg10: memref<1x64xf32, #tpu.memory_space<vmem>>, %arg11: memref<32x32xbf16, #tpu.memory_space<vmem>>, %arg12: memref<1x32xf32, #tpu.memory_space<vmem>>, %arg13: memref<1x8x32xf32, #tpu.memory_space<vmem>>, %arg14: memref<1x4x8x16xf32, #tpu.memory_space<vmem>>) attributes {dimension_semantics = [#tpu.dimension_semantics<parallel>, #tpu.dimension_semantics<parallel>], iteration_bounds = array<i64: 2, 1>, scalar_prefetch = 0 : i64, scratch_operands = 0 : i64, tpu.core_type = #tpu.core_type<tc>, window_params = [{transform_indices = @transform_0, window_bounds = array<i64: 1, 8, 32>}, {transform_indices = @transform_1, window_bounds = array<i64: 1, 16, 32>}, {transform_indices = @transform_2, window_bounds = array<i64: 1, 1, 8, 16>}, {pipeline_mode = #tpu.pipeline_mode<synchronous>, transform_indices = @transform_3, window_bounds = array<i64: 1, 32>}, {pipeline_mode = #tpu.pipeline_mode<synchronous>, transform_indices = @transform_4, window_bounds = array<i64: 1, 32>}, {pipeline_mode = #tpu.pipeline_mode<synchronous>, transform_indices = @transform_5, window_bounds = array<i64: 32, 32>}, {pipeline_mode = #tpu.pipeline_mode<synchronous>, transform_indices = @transform_6, window_bounds = array<i64: 1, 32>}, {pipeline_mode = #tpu.pipeline_mode<synchronous>, transform_indices = @transform_7, window_bounds = array<i64: 32, 64>}, {pipeline_mode = #tpu.pipeline_mode<synchronous>, transform_indices = @transform_8, window_bounds = array<i64: 1, 64>}, {pipeline_mode = #tpu.pipeline_mode<synchronous>, transform_indices = @transform_9, window_bounds = array<i64: 32, 32>}, {pipeline_mode = #tpu.pipeline_mode<synchronous>, transform_indices = @transform_10, window_bounds = array<i64: 1, 32>}, {transform_indices = @transform_11, window_bounds = array<i64: 1, 8, 32>}, {transform_indices = @transform_12, window_bounds = array<i64: 1, 4, 8, 16>}]} {
    %c0 = arith.constant 0 : index
    %c0_0 = arith.constant 0 : index
    %0 = vector.load %arg5[%c0, %c0_0] : memref<1x32xf32, #tpu.memory_space<vmem>>, vector<1x32xf32>
    %c0_1 = arith.constant 0 : index
    %c0_2 = arith.constant 0 : index
    %1 = vector.load %arg6[%c0_1, %c0_2] : memref<1x32xf32, #tpu.memory_space<vmem>>, vector<1x32xf32>
    %c0_3 = arith.constant 0 : index
    %c0_4 = arith.constant 0 : index
    %c0_5 = arith.constant 0 : index
    %2 = vector.load %arg2[%c0_3, %c0_4, %c0_5] : memref<1x8x32xf32, #tpu.memory_space<vmem>>, vector<1x8x32xf32>
    %3 = vector.shape_cast %2 : vector<1x8x32xf32> to vector<8x32xf32>
    %cst = arith.constant dense<0.000000e+00> : vector<8xf32>
    %4 = vector.multi_reduction <add>, %3, %cst [1] : vector<8x32xf32> to vector<8xf32>
    %5 = vector.shape_cast %4 : vector<8xf32> to vector<8x1xf32>
    %cst_6 = arith.constant 3.200000e+01 : f32
    %6 = vector.broadcast %cst_6 : f32 to vector<8x1xf32>
    %7 = arith.divf %5, %6 : vector<8x1xf32>
    %8 = vector.broadcast %7 : vector<8x1xf32> to vector<8x32xf32>
    %9 = arith.subf %3, %8 : vector<8x32xf32>
    %10 = arith.mulf %9, %9 : vector<8x32xf32>
    %cst_7 = arith.constant dense<0.000000e+00> : vector<8xf32>
    %11 = vector.multi_reduction <add>, %10, %cst_7 [1] : vector<8x32xf32> to vector<8xf32>
    %12 = vector.shape_cast %11 : vector<8xf32> to vector<8x1xf32>
    %cst_8 = arith.constant 3.200000e+01 : f32
    %13 = vector.broadcast %cst_8 : f32 to vector<8x1xf32>
    %14 = arith.divf %12, %13 : vector<8x1xf32>
    %15 = vector.broadcast %7 : vector<8x1xf32> to vector<8x32xf32>
    %16 = arith.subf %3, %15 : vector<8x32xf32>
    %cst_9 = arith.constant 9.99999997E-7 : f32
    %17 = vector.broadcast %cst_9 : f32 to vector<8x1xf32>
    %18 = arith.addf %14, %17 : vector<8x1xf32>
    %19 = math.rsqrt %18 : vector<8x1xf32>
    %20 = vector.broadcast %19 : vector<8x1xf32> to vector<8x32xf32>
    %21 = arith.mulf %16, %20 : vector<8x32xf32>
    %22 = vector.broadcast %0 : vector<1x32xf32> to vector<8x32xf32>
    %23 = arith.mulf %21, %22 : vector<8x32xf32>
    %24 = vector.broadcast %1 : vector<1x32xf32> to vector<8x32xf32>
    %25 = arith.addf %23, %24 : vector<8x32xf32>
    %26 = arith.truncf %25 : vector<8x32xf32> to vector<8x32xbf16>
    %c0_10 = arith.constant 0 : index
    %c0_11 = arith.constant 0 : index
    %c0_12 = arith.constant 0 : index
    %27 = vector.load %arg3[%c0_10, %c0_11, %c0_12] : memref<1x16x32xf32, #tpu.memory_space<vmem>>, vector<1x16x32xf32>
    %28 = vector.shape_cast %27 : vector<1x16x32xf32> to vector<16x32xf32>
    %29 = arith.truncf %28 : vector<16x32xf32> to vector<16x32xbf16>
    %c0_13 = arith.constant 0 : index
    %c0_14 = arith.constant 0 : index
    %30 = vector.load %arg7[%c0_13, %c0_14] : memref<32x32xbf16, #tpu.memory_space<vmem>>, vector<32x32xbf16>
    %cst_15 = arith.constant dense<0.000000e+00> : vector<8x32xf32>
    %31 = tpu.matmul %26, %30, %cst_15 {dimension_numbers = #tpu.dot_dimension_numbers<[1], [0], [0], [1], [0, 0, 1, 1], [], []>} : vector<8x32xbf16>, vector<32x32xbf16>, vector<8x32xf32> -> vector<8x32xf32>
    %c0_16 = arith.constant 0 : index
    %c0_17 = arith.constant 0 : index
    %32 = vector.load %arg8[%c0_16, %c0_17] : memref<1x32xf32, #tpu.memory_space<vmem>>, vector<1x32xf32>
    %33 = vector.broadcast %32 : vector<1x32xf32> to vector<8x32xf32>
    %34 = arith.addf %31, %33 : vector<8x32xf32>
    %c0_18 = arith.constant 0 : index
    %c0_19 = arith.constant 0 : index
    %35 = vector.load %arg9[%c0_18, %c0_19] : memref<32x64xbf16, #tpu.memory_space<vmem>>, vector<32x64xbf16>
    %cst_20 = arith.constant dense<0.000000e+00> : vector<16x64xf32>
    %36 = tpu.matmul %29, %35, %cst_20 {dimension_numbers = #tpu.dot_dimension_numbers<[1], [0], [0], [1], [0, 0, 1, 1], [], []>} : vector<16x32xbf16>, vector<32x64xbf16>, vector<16x64xf32> -> vector<16x64xf32>
    %c0_21 = arith.constant 0 : index
    %c0_22 = arith.constant 0 : index
    %37 = vector.load %arg10[%c0_21, %c0_22] : memref<1x64xf32, #tpu.memory_space<vmem>>, vector<1x64xf32>
    %38 = vector.broadcast %37 : vector<1x64xf32> to vector<16x64xf32>
    %39 = arith.addf %36, %38 : vector<16x64xf32>
    %c0_23 = arith.constant 0 : index
    %c0_24 = arith.constant 0 : index
    %c0_25 = arith.constant 0 : index
    %c0_26 = arith.constant 0 : index
    %40 = vector.load %arg4[%c0_23, %c0_24, %c0_25, %c0_26] : memref<1x1x8x16xi32, #tpu.memory_space<vmem>>, vector<1x1x8x16xi32>
    %41 = vector.shape_cast %40 : vector<1x1x8x16xi32> to vector<8x16xi32>
    %c0_27 = arith.constant 0 : index
    %c0_28 = arith.constant 0 : index
    %42 = vector.load %arg11[%c0_27, %c0_28] : memref<32x32xbf16, #tpu.memory_space<vmem>>, vector<32x32xbf16>
    %c0_i32 = arith.constant 0 : i32
    %43 = vector.broadcast %c0_i32 : i32 to vector<8x16xi32>
    %44 = arith.cmpi eq, %41, %43 : vector<8x16xi32>
    %cst_29 = arith.constant -1.000000e+09 : f32
    %cst_30 = arith.constant 0.000000e+00 : f32
    %45 = vector.broadcast %cst_29 : f32 to vector<8x16xf32>
    %46 = vector.broadcast %cst_30 : f32 to vector<8x16xf32>
    %47 = arith.select %44, %45, %46 : vector<8x16xi1>, vector<8x16xf32>
    %48 = arith.truncf %34 : vector<8x32xf32> to vector<8x32xbf16>
    %49 = vector.extract_strided_slice %39 {offsets = [0, 0], sizes = [16, 32], strides = [1, 1]} : vector<16x64xf32> to vector<16x32xf32>
    %50 = arith.truncf %49 : vector<16x32xf32> to vector<16x32xbf16>
    %51 = vector.extract_strided_slice %39 {offsets = [0, 32], sizes = [16, 32], strides = [1, 1]} : vector<16x64xf32> to vector<16x32xf32>
    %52 = arith.truncf %51 : vector<16x32xf32> to vector<16x32xbf16>
    %53 = vector.extract_strided_slice %48 {offsets = [0, 0], sizes = [8, 8], strides = [1, 1]} : vector<8x32xbf16> to vector<8x8xbf16>
    %54 = vector.extract_strided_slice %50 {offsets = [0, 0], sizes = [16, 8], strides = [1, 1]} : vector<16x32xbf16> to vector<16x8xbf16>
    %55 = tpu.transpose %54, [1, 0] : vector<16x8xbf16> -> vector<8x16xbf16>
    %cst_31 = arith.constant dense<0.000000e+00> : vector<8x16xf32>
    %56 = tpu.matmul %53, %55, %cst_31 {dimension_numbers = #tpu.dot_dimension_numbers<[1], [0], [0], [1], [0, 0, 1, 1], [], []>} : vector<8x8xbf16>, vector<8x16xbf16>, vector<8x16xf32> -> vector<8x16xf32>
    %cst_32 = arith.constant 0.353553385 : f32
    %57 = vector.broadcast %cst_32 : f32 to vector<8x16xf32>
    %58 = arith.mulf %56, %57 : vector<8x16xf32>
    %59 = arith.addf %58, %47 : vector<8x16xf32>
    %cst_33 = arith.constant dense<0xFF800000> : vector<8xf32>
    %60 = vector.multi_reduction <maximumf>, %59, %cst_33 [1] : vector<8x16xf32> to vector<8xf32>
    %61 = vector.shape_cast %60 : vector<8xf32> to vector<8x1xf32>
    %62 = vector.broadcast %61 : vector<8x1xf32> to vector<8x16xf32>
    %63 = arith.subf %59, %62 : vector<8x16xf32>
    %64 = math.exp %63 : vector<8x16xf32>
    %cst_34 = arith.constant dense<0.000000e+00> : vector<8xf32>
    %65 = vector.multi_reduction <add>, %64, %cst_34 [1] : vector<8x16xf32> to vector<8xf32>
    %66 = vector.shape_cast %65 : vector<8xf32> to vector<8x1xf32>
    %67 = vector.broadcast %66 : vector<8x1xf32> to vector<8x16xf32>
    %68 = arith.divf %64, %67 : vector<8x16xf32>
    %c0_35 = arith.constant 0 : index
    %c0_36 = arith.constant 0 : index
    %c0_37 = arith.constant 0 : index
    %c0_38 = arith.constant 0 : index
    %69 = vector.load %arg14[%c0_35, %c0_36, %c0_37, %c0_38] : memref<1x4x8x16xf32, #tpu.memory_space<vmem>>, vector<1x1x8x16xf32>
    %70 = vector.shape_cast %69 : vector<1x1x8x16xf32> to vector<8x16xf32>
    %71 = vector.shape_cast %68 : vector<8x16xf32> to vector<1x1x8x16xf32>
    tpu.vector_store %arg14[%c0_35, %c0_36, %c0_37, %c0_38], %71 {strides = array<i32>} : memref<1x4x8x16xf32, #tpu.memory_space<vmem>>, vector<1x1x8x16xf32>,
    %72 = arith.truncf %68 : vector<8x16xf32> to vector<8x16xbf16>
    %73 = vector.extract_strided_slice %52 {offsets = [0, 0], sizes = [16, 8], strides = [1, 1]} : vector<16x32xbf16> to vector<16x8xbf16>
    %cst_39 = arith.constant dense<0.000000e+00> : vector<8x8xf32>
    %74 = tpu.matmul %72, %73, %cst_39 {dimension_numbers = #tpu.dot_dimension_numbers<[1], [0], [0], [1], [0, 0, 1, 1], [], []>} : vector<8x16xbf16>, vector<16x8xbf16>, vector<8x8xf32> -> vector<8x8xf32>
    %75 = vector.extract_strided_slice %48 {offsets = [0, 8], sizes = [8, 8], strides = [1, 1]} : vector<8x32xbf16> to vector<8x8xbf16>
    %76 = vector.extract_strided_slice %50 {offsets = [0, 8], sizes = [16, 8], strides = [1, 1]} : vector<16x32xbf16> to vector<16x8xbf16>
    %77 = tpu.transpose %76, [1, 0] : vector<16x8xbf16> -> vector<8x16xbf16>
    %cst_40 = arith.constant dense<0.000000e+00> : vector<8x16xf32>
    %78 = tpu.matmul %75, %77, %cst_40 {dimension_numbers = #tpu.dot_dimension_numbers<[1], [0], [0], [1], [0, 0, 1, 1], [], []>} : vector<8x8xbf16>, vector<8x16xbf16>, vector<8x16xf32> -> vector<8x16xf32>
    %cst_41 = arith.constant 0.353553385 : f32
    %79 = vector.broadcast %cst_41 : f32 to vector<8x16xf32>
    %80 = arith.mulf %78, %79 : vector<8x16xf32>
    %81 = arith.addf %80, %47 : vector<8x16xf32>
    %cst_42 = arith.constant dense<0xFF800000> : vector<8xf32>
    %82 = vector.multi_reduction <maximumf>, %81, %cst_42 [1] : vector<8x16xf32> to vector<8xf32>
    %83 = vector.shape_cast %82 : vector<8xf32> to vector<8x1xf32>
    %84 = vector.broadcast %83 : vector<8x1xf32> to vector<8x16xf32>
    %85 = arith.subf %81, %84 : vector<8x16xf32>
    %86 = math.exp %85 : vector<8x16xf32>
    %cst_43 = arith.constant dense<0.000000e+00> : vector<8xf32>
    %87 = vector.multi_reduction <add>, %86, %cst_43 [1] : vector<8x16xf32> to vector<8xf32>
    %88 = vector.shape_cast %87 : vector<8xf32> to vector<8x1xf32>
    %89 = vector.broadcast %88 : vector<8x1xf32> to vector<8x16xf32>
    %90 = arith.divf %86, %89 : vector<8x16xf32>
    %c0_44 = arith.constant 0 : index
    %c1 = arith.constant 1 : index
    %c0_45 = arith.constant 0 : index
    %c0_46 = arith.constant 0 : index
    %91 = vector.load %arg14[%c0_44, %c1, %c0_45, %c0_46] : memref<1x4x8x16xf32, #tpu.memory_space<vmem>>, vector<1x1x8x16xf32>
    %92 = vector.shape_cast %91 : vector<1x1x8x16xf32> to vector<8x16xf32>
    %93 = vector.shape_cast %90 : vector<8x16xf32> to vector<1x1x8x16xf32>
    tpu.vector_store %arg14[%c0_44, %c1, %c0_45, %c0_46], %93 {strides = array<i32>} : memref<1x4x8x16xf32, #tpu.memory_space<vmem>>, vector<1x1x8x16xf32>,
    %94 = arith.truncf %90 : vector<8x16xf32> to vector<8x16xbf16>
    %95 = vector.extract_strided_slice %52 {offsets = [0, 8], sizes = [16, 8], strides = [1, 1]} : vector<16x32xbf16> to vector<16x8xbf16>
    %cst_47 = arith.constant dense<0.000000e+00> : vector<8x8xf32>
    %96 = tpu.matmul %94, %95, %cst_47 {dimension_numbers = #tpu.dot_dimension_numbers<[1], [0], [0], [1], [0, 0, 1, 1], [], []>} : vector<8x16xbf16>, vector<16x8xbf16>, vector<8x8xf32> -> vector<8x8xf32>
    %97 = vector.extract_strided_slice %48 {offsets = [0, 16], sizes = [8, 8], strides = [1, 1]} : vector<8x32xbf16> to vector<8x8xbf16>
    %98 = vector.extract_strided_slice %50 {offsets = [0, 16], sizes = [16, 8], strides = [1, 1]} : vector<16x32xbf16> to vector<16x8xbf16>
    %99 = tpu.transpose %98, [1, 0] : vector<16x8xbf16> -> vector<8x16xbf16>
    %cst_48 = arith.constant dense<0.000000e+00> : vector<8x16xf32>
    %100 = tpu.matmul %97, %99, %cst_48 {dimension_numbers = #tpu.dot_dimension_numbers<[1], [0], [0], [1], [0, 0, 1, 1], [], []>} : vector<8x8xbf16>, vector<8x16xbf16>, vector<8x16xf32> -> vector<8x16xf32>
    %cst_49 = arith.constant 0.353553385 : f32
    %101 = vector.broadcast %cst_49 : f32 to vector<8x16xf32>
    %102 = arith.mulf %100, %101 : vector<8x16xf32>
    %103 = arith.addf %102, %47 : vector<8x16xf32>
    %cst_50 = arith.constant dense<0xFF800000> : vector<8xf32>
    %104 = vector.multi_reduction <maximumf>, %103, %cst_50 [1] : vector<8x16xf32> to vector<8xf32>
    %105 = vector.shape_cast %104 : vector<8xf32> to vector<8x1xf32>
    %106 = vector.broadcast %105 : vector<8x1xf32> to vector<8x16xf32>
    %107 = arith.subf %103, %106 : vector<8x16xf32>
    %108 = math.exp %107 : vector<8x16xf32>
    %cst_51 = arith.constant dense<0.000000e+00> : vector<8xf32>
    %109 = vector.multi_reduction <add>, %108, %cst_51 [1] : vector<8x16xf32> to vector<8xf32>
    %110 = vector.shape_cast %109 : vector<8xf32> to vector<8x1xf32>
    %111 = vector.broadcast %110 : vector<8x1xf32> to vector<8x16xf32>
    %112 = arith.divf %108, %111 : vector<8x16xf32>
    %c0_52 = arith.constant 0 : index
    %c2 = arith.constant 2 : index
    %c0_53 = arith.constant 0 : index
    %c0_54 = arith.constant 0 : index
    %113 = vector.load %arg14[%c0_52, %c2, %c0_53, %c0_54] : memref<1x4x8x16xf32, #tpu.memory_space<vmem>>, vector<1x1x8x16xf32>
    %114 = vector.shape_cast %113 : vector<1x1x8x16xf32> to vector<8x16xf32>
    %115 = vector.shape_cast %112 : vector<8x16xf32> to vector<1x1x8x16xf32>
    tpu.vector_store %arg14[%c0_52, %c2, %c0_53, %c0_54], %115 {strides = array<i32>} : memref<1x4x8x16xf32, #tpu.memory_space<vmem>>, vector<1x1x8x16xf32>,
    %116 = arith.truncf %112 : vector<8x16xf32> to vector<8x16xbf16>
    %117 = vector.extract_strided_slice %52 {offsets = [0, 16], sizes = [16, 8], strides = [1, 1]} : vector<16x32xbf16> to vector<16x8xbf16>
    %cst_55 = arith.constant dense<0.000000e+00> : vector<8x8xf32>
    %118 = tpu.matmul %116, %117, %cst_55 {dimension_numbers = #tpu.dot_dimension_numbers<[1], [0], [0], [1], [0, 0, 1, 1], [], []>} : vector<8x16xbf16>, vector<16x8xbf16>, vector<8x8xf32> -> vector<8x8xf32>
    %119 = vector.extract_strided_slice %48 {offsets = [0, 24], sizes = [8, 8], strides = [1, 1]} : vector<8x32xbf16> to vector<8x8xbf16>
    %120 = vector.extract_strided_slice %50 {offsets = [0, 24], sizes = [16, 8], strides = [1, 1]} : vector<16x32xbf16> to vector<16x8xbf16>
    %121 = tpu.transpose %120, [1, 0] : vector<16x8xbf16> -> vector<8x16xbf16>
    %cst_56 = arith.constant dense<0.000000e+00> : vector<8x16xf32>
    %122 = tpu.matmul %119, %121, %cst_56 {dimension_numbers = #tpu.dot_dimension_numbers<[1], [0], [0], [1], [0, 0, 1, 1], [], []>} : vector<8x8xbf16>, vector<8x16xbf16>, vector<8x16xf32> -> vector<8x16xf32>
    %cst_57 = arith.constant 0.353553385 : f32
    %123 = vector.broadcast %cst_57 : f32 to vector<8x16xf32>
    %124 = arith.mulf %122, %123 : vector<8x16xf32>
    %125 = arith.addf %124, %47 : vector<8x16xf32>
    %cst_58 = arith.constant dense<0xFF800000> : vector<8xf32>
    %126 = vector.multi_reduction <maximumf>, %125, %cst_58 [1] : vector<8x16xf32> to vector<8xf32>
    %127 = vector.shape_cast %126 : vector<8xf32> to vector<8x1xf32>
    %128 = vector.broadcast %127 : vector<8x1xf32> to vector<8x16xf32>
    %129 = arith.subf %125, %128 : vector<8x16xf32>
    %130 = math.exp %129 : vector<8x16xf32>
    %cst_59 = arith.constant dense<0.000000e+00> : vector<8xf32>
    %131 = vector.multi_reduction <add>, %130, %cst_59 [1] : vector<8x16xf32> to vector<8xf32>
    %132 = vector.shape_cast %131 : vector<8xf32> to vector<8x1xf32>
    %133 = vector.broadcast %132 : vector<8x1xf32> to vector<8x16xf32>
    %134 = arith.divf %130, %133 : vector<8x16xf32>
    %c0_60 = arith.constant 0 : index
    %c3 = arith.constant 3 : index
    %c0_61 = arith.constant 0 : index
    %c0_62 = arith.constant 0 : index
    %135 = vector.load %arg14[%c0_60, %c3, %c0_61, %c0_62] : memref<1x4x8x16xf32, #tpu.memory_space<vmem>>, vector<1x1x8x16xf32>
    %136 = vector.shape_cast %135 : vector<1x1x8x16xf32> to vector<8x16xf32>
    %137 = vector.shape_cast %134 : vector<8x16xf32> to vector<1x1x8x16xf32>
    tpu.vector_store %arg14[%c0_60, %c3, %c0_61, %c0_62], %137 {strides = array<i32>} : memref<1x4x8x16xf32, #tpu.memory_space<vmem>>, vector<1x1x8x16xf32>,
    %138 = arith.truncf %134 : vector<8x16xf32> to vector<8x16xbf16>
    %139 = vector.extract_strided_slice %52 {offsets = [0, 24], sizes = [16, 8], strides = [1, 1]} : vector<16x32xbf16> to vector<16x8xbf16>
    %cst_63 = arith.constant dense<0.000000e+00> : vector<8x8xf32>
    %140 = tpu.matmul %138, %139, %cst_63 {dimension_numbers = #tpu.dot_dimension_numbers<[1], [0], [0], [1], [0, 0, 1, 1], [], []>} : vector<8x16xbf16>, vector<16x8xbf16>, vector<8x8xf32> -> vector<8x8xf32>
    %141 = tpu.concatenate %74, %96, %118, %140 in 1 : vector<8x8xf32>, vector<8x8xf32>, vector<8x8xf32>, vector<8x8xf32> -> vector<8x32xf32>
    %142 = arith.truncf %141 : vector<8x32xf32> to vector<8x32xbf16>
    %cst_64 = arith.constant dense<0.000000e+00> : vector<8x32xf32>
    %143 = tpu.matmul %142, %42, %cst_64 {dimension_numbers = #tpu.dot_dimension_numbers<[1], [0], [0], [1], [0, 0, 1, 1], [], []>} : vector<8x32xbf16>, vector<32x32xbf16>, vector<8x32xf32> -> vector<8x32xf32>
    %144 = arith.addf %3, %143 : vector<8x32xf32>
    %c0_65 = arith.constant 0 : index
    %c0_66 = arith.constant 0 : index
    %145 = vector.load %arg12[%c0_65, %c0_66] : memref<1x32xf32, #tpu.memory_space<vmem>>, vector<1x32xf32>
    %146 = vector.broadcast %145 : vector<1x32xf32> to vector<8x32xf32>
    %147 = arith.addf %144, %146 : vector<8x32xf32>
    %c0_67 = arith.constant 0 : index
    %c0_68 = arith.constant 0 : index
    %c0_69 = arith.constant 0 : index
    %148 = vector.load %arg13[%c0_67, %c0_68, %c0_69] : memref<1x8x32xf32, #tpu.memory_space<vmem>>, vector<1x8x32xf32>
    %149 = vector.shape_cast %148 : vector<1x8x32xf32> to vector<8x32xf32>
    %150 = vector.shape_cast %147 : vector<8x32xf32> to vector<1x8x32xf32>
    tpu.vector_store %arg13[%c0_67, %c0_68, %c0_69], %150 {strides = array<i32>} : memref<1x8x32xf32, #tpu.memory_space<vmem>>, vector<1x8x32xf32>,
    return
  }
  func.func @transform_0(%arg0: i32, %arg1: i32) -> (i32, i32, i32) {
    %c0_i32 = arith.constant 0 : i32
    %c0_i32_0 = arith.constant 0 : i32
    return %arg0, %arg1, %c0_i32 : i32, i32, i32
  }
  func.func @transform_1(%arg0: i32, %arg1: i32) -> (i32, i32, i32) {
    %c0_i32 = arith.constant 0 : i32
    %c0_i32_0 = arith.constant 0 : i32
    %c0_i32_1 = arith.constant 0 : i32
    return %arg0, %c0_i32, %c0_i32_0 : i32, i32, i32
  }
  func.func @transform_2(%arg0: i32, %arg1: i32) -> (i32, i32, i32, i32) {
    %c0_i32 = arith.constant 0 : i32
    %c0_i32_0 = arith.constant 0 : i32
    %c0_i32_1 = arith.constant 0 : i32
    return %arg0, %c0_i32, %arg1, %c0_i32_0 : i32, i32, i32, i32
  }
  func.func @transform_3(%arg0: i32, %arg1: i32) -> (i32, i32) {
    %c0_i32 = arith.constant 0 : i32
    %c0_i32_0 = arith.constant 0 : i32
    %c0_i32_1 = arith.constant 0 : i32
    return %c0_i32, %c0_i32_0 : i32, i32
  }
  func.func @transform_4(%arg0: i32, %arg1: i32) -> (i32, i32) {
    %c0_i32 = arith.constant 0 : i32
    %c0_i32_0 = arith.constant 0 : i32
    %c0_i32_1 = arith.constant 0 : i32
    return %c0_i32, %c0_i32_0 : i32, i32
  }
  func.func @transform_5(%arg0: i32, %arg1: i32) -> (i32, i32) {
    %c0_i32 = arith.constant 0 : i32
    %c0_i32_0 = arith.constant 0 : i32
    %c0_i32_1 = arith.constant 0 : i32
    return %c0_i32, %c0_i32_0 : i32, i32
  }
  func.func @transform_6(%arg0: i32, %arg1: i32) -> (i32, i32) {
    %c0_i32 = arith.constant 0 : i32
    %c0_i32_0 = arith.constant 0 : i32
    %c0_i32_1 = arith.constant 0 : i32
    return %c0_i32, %c0_i32_0 : i32, i32
  }
  func.func @transform_7(%arg0: i32, %arg1: i32) -> (i32, i32) {
    %c0_i32 = arith.constant 0 : i32
    %c0_i32_0 = arith.constant 0 : i32
    %c0_i32_1 = arith.constant 0 : i32
    return %c0_i32, %c0_i32_0 : i32, i32
  }
  func.func @transform_8(%arg0: i32, %arg1: i32) -> (i32, i32) {
    %c0_i32 = arith.constant 0 : i32
    %c0_i32_0 = arith.constant 0 : i32
    %c0_i32_1 = arith.constant 0 : i32
    return %c0_i32, %c0_i32_0 : i32, i32
  }
  func.func @transform_9(%arg0: i32, %arg1: i32) -> (i32, i32) {
    %c0_i32 = arith.constant 0 : i32
    %c0_i32_0 = arith.constant 0 : i32
    %c0_i32_1 = arith.constant 0 : i32
    return %c0_i32, %c0_i32_0 : i32, i32
  }
  func.func @transform_10(%arg0: i32, %arg1: i32) -> (i32, i32) {
    %c0_i32 = arith.constant 0 : i32
    %c0_i32_0 = arith.constant 0 : i32
    %c0_i32_1 = arith.constant 0 : i32
    return %c0_i32, %c0_i32_0 : i32, i32
  }
  func.func @transform_11(%arg0: i32, %arg1: i32) -> (i32, i32, i32) {
    %c0_i32 = arith.constant 0 : i32
    %c0_i32_0 = arith.constant 0 : i32
    return %arg0, %arg1, %c0_i32 : i32, i32, i32
  }
  func.func @transform_12(%arg0: i32, %arg1: i32) -> (i32, i32, i32, i32) {
    %c0_i32 = arith.constant 0 : i32
    %c0_i32_0 = arith.constant 0 : i32
    %c0_i32_1 = arith.constant 0 : i32
    return %arg0, %c0_i32, %arg1, %c0_i32_0 : i32, i32, i32, i32
  }
}

module attributes {stable_mosaic.version = 11 : i64} {
  func.func @self_attn_kernel(%arg0: i32, %arg1: i32, %arg2: memref<1x8x32xf32, #tpu.memory_space<vmem>>, %arg3: memref<1x8x32xf32, #tpu.memory_space<vmem>>, %arg4: memref<1x1x8x8xi32, #tpu.memory_space<vmem>>, %arg5: memref<1x32xf32, #tpu.memory_space<vmem>>, %arg6: memref<1x32xf32, #tpu.memory_space<vmem>>, %arg7: memref<32x32xbf16, #tpu.memory_space<vmem>>, %arg8: memref<1x32xf32, #tpu.memory_space<vmem>>, %arg9: memref<32x64xbf16, #tpu.memory_space<vmem>>, %arg10: memref<1x64xf32, #tpu.memory_space<vmem>>, %arg11: memref<32x32xbf16, #tpu.memory_space<vmem>>, %arg12: memref<1x32xf32, #tpu.memory_space<vmem>>, %arg13: memref<1x8x32xf32, #tpu.memory_space<vmem>>) attributes {dimension_semantics = [#tpu.dimension_semantics<parallel>, #tpu.dimension_semantics<parallel>], iteration_bounds = array<i64: 2, 1>, scalar_prefetch = 0 : i64, scratch_operands = 0 : i64, tpu.core_type = #tpu.core_type<tc>, window_params = [{transform_indices = @transform_0, window_bounds = array<i64: 1, 8, 32>}, {transform_indices = @transform_1, window_bounds = array<i64: 1, 8, 32>}, {transform_indices = @transform_2, window_bounds = array<i64: 1, 1, 8, 8>}, {pipeline_mode = #tpu.pipeline_mode<synchronous>, transform_indices = @transform_3, window_bounds = array<i64: 1, 32>}, {pipeline_mode = #tpu.pipeline_mode<synchronous>, transform_indices = @transform_4, window_bounds = array<i64: 1, 32>}, {pipeline_mode = #tpu.pipeline_mode<synchronous>, transform_indices = @transform_5, window_bounds = array<i64: 32, 32>}, {pipeline_mode = #tpu.pipeline_mode<synchronous>, transform_indices = @transform_6, window_bounds = array<i64: 1, 32>}, {pipeline_mode = #tpu.pipeline_mode<synchronous>, transform_indices = @transform_7, window_bounds = array<i64: 32, 64>}, {pipeline_mode = #tpu.pipeline_mode<synchronous>, transform_indices = @transform_8, window_bounds = array<i64: 1, 64>}, {pipeline_mode = #tpu.pipeline_mode<synchronous>, transform_indices = @transform_9, window_bounds = array<i64: 32, 32>}, {pipeline_mode = #tpu.pipeline_mode<synchronous>, transform_indices = @transform_10, window_bounds = array<i64: 1, 32>}, {transform_indices = @transform_11, window_bounds = array<i64: 1, 8, 32>}]} {
    %c0 = arith.constant 0 : index
    %c0_0 = arith.constant 0 : index
    %0 = vector.load %arg5[%c0, %c0_0] : memref<1x32xf32, #tpu.memory_space<vmem>>, vector<1x32xf32>
    %c0_1 = arith.constant 0 : index
    %c0_2 = arith.constant 0 : index
    %1 = vector.load %arg6[%c0_1, %c0_2] : memref<1x32xf32, #tpu.memory_space<vmem>>, vector<1x32xf32>
    %c0_3 = arith.constant 0 : index
    %c0_4 = arith.constant 0 : index
    %c0_5 = arith.constant 0 : index
    %2 = vector.load %arg2[%c0_3, %c0_4, %c0_5] : memref<1x8x32xf32, #tpu.memory_space<vmem>>, vector<1x8x32xf32>
    %3 = vector.shape_cast %2 : vector<1x8x32xf32> to vector<8x32xf32>
    %c0_6 = arith.constant 0 : index
    %c0_7 = arith.constant 0 : index
    %c0_8 = arith.constant 0 : index
    %4 = vector.load %arg3[%c0_6, %c0_7, %c0_8] : memref<1x8x32xf32, #tpu.memory_space<vmem>>, vector<1x8x32xf32>
    %5 = vector.shape_cast %4 : vector<1x8x32xf32> to vector<8x32xf32>
    %cst = arith.constant dense<0.000000e+00> : vector<8xf32>
    %6 = vector.multi_reduction <add>, %3, %cst [1] : vector<8x32xf32> to vector<8xf32>
    %7 = vector.shape_cast %6 : vector<8xf32> to vector<8x1xf32>
    %cst_9 = arith.constant 3.200000e+01 : f32
    %8 = vector.broadcast %cst_9 : f32 to vector<8x1xf32>
    %9 = arith.divf %7, %8 : vector<8x1xf32>
    %10 = vector.broadcast %9 : vector<8x1xf32> to vector<8x32xf32>
    %11 = arith.subf %3, %10 : vector<8x32xf32>
    %12 = arith.mulf %11, %11 : vector<8x32xf32>
    %cst_10 = arith.constant dense<0.000000e+00> : vector<8xf32>
    %13 = vector.multi_reduction <add>, %12, %cst_10 [1] : vector<8x32xf32> to vector<8xf32>
    %14 = vector.shape_cast %13 : vector<8xf32> to vector<8x1xf32>
    %cst_11 = arith.constant 3.200000e+01 : f32
    %15 = vector.broadcast %cst_11 : f32 to vector<8x1xf32>
    %16 = arith.divf %14, %15 : vector<8x1xf32>
    %17 = vector.broadcast %9 : vector<8x1xf32> to vector<8x32xf32>
    %18 = arith.subf %3, %17 : vector<8x32xf32>
    %cst_12 = arith.constant 9.99999997E-7 : f32
    %19 = vector.broadcast %cst_12 : f32 to vector<8x1xf32>
    %20 = arith.addf %16, %19 : vector<8x1xf32>
    %21 = math.rsqrt %20 : vector<8x1xf32>
    %22 = vector.broadcast %21 : vector<8x1xf32> to vector<8x32xf32>
    %23 = arith.mulf %18, %22 : vector<8x32xf32>
    %24 = vector.broadcast %0 : vector<1x32xf32> to vector<8x32xf32>
    %25 = arith.mulf %23, %24 : vector<8x32xf32>
    %26 = vector.broadcast %1 : vector<1x32xf32> to vector<8x32xf32>
    %27 = arith.addf %25, %26 : vector<8x32xf32>
    %28 = arith.truncf %27 : vector<8x32xf32> to vector<8x32xbf16>
    %cst_13 = arith.constant dense<0.000000e+00> : vector<8xf32>
    %29 = vector.multi_reduction <add>, %5, %cst_13 [1] : vector<8x32xf32> to vector<8xf32>
    %30 = vector.shape_cast %29 : vector<8xf32> to vector<8x1xf32>
    %cst_14 = arith.constant 3.200000e+01 : f32
    %31 = vector.broadcast %cst_14 : f32 to vector<8x1xf32>
    %32 = arith.divf %30, %31 : vector<8x1xf32>
    %33 = vector.broadcast %32 : vector<8x1xf32> to vector<8x32xf32>
    %34 = arith.subf %5, %33 : vector<8x32xf32>
    %35 = arith.mulf %34, %34 : vector<8x32xf32>
    %cst_15 = arith.constant dense<0.000000e+00> : vector<8xf32>
    %36 = vector.multi_reduction <add>, %35, %cst_15 [1] : vector<8x32xf32> to vector<8xf32>
    %37 = vector.shape_cast %36 : vector<8xf32> to vector<8x1xf32>
    %cst_16 = arith.constant 3.200000e+01 : f32
    %38 = vector.broadcast %cst_16 : f32 to vector<8x1xf32>
    %39 = arith.divf %37, %38 : vector<8x1xf32>
    %40 = vector.broadcast %32 : vector<8x1xf32> to vector<8x32xf32>
    %41 = arith.subf %5, %40 : vector<8x32xf32>
    %cst_17 = arith.constant 9.99999997E-7 : f32
    %42 = vector.broadcast %cst_17 : f32 to vector<8x1xf32>
    %43 = arith.addf %39, %42 : vector<8x1xf32>
    %44 = math.rsqrt %43 : vector<8x1xf32>
    %45 = vector.broadcast %44 : vector<8x1xf32> to vector<8x32xf32>
    %46 = arith.mulf %41, %45 : vector<8x32xf32>
    %47 = vector.broadcast %0 : vector<1x32xf32> to vector<8x32xf32>
    %48 = arith.mulf %46, %47 : vector<8x32xf32>
    %49 = vector.broadcast %1 : vector<1x32xf32> to vector<8x32xf32>
    %50 = arith.addf %48, %49 : vector<8x32xf32>
    %51 = arith.truncf %50 : vector<8x32xf32> to vector<8x32xbf16>
    %c0_18 = arith.constant 0 : index
    %c0_19 = arith.constant 0 : index
    %52 = vector.load %arg7[%c0_18, %c0_19] : memref<32x32xbf16, #tpu.memory_space<vmem>>, vector<32x32xbf16>
    %cst_20 = arith.constant dense<0.000000e+00> : vector<8x32xf32>
    %53 = tpu.matmul %28, %52, %cst_20 {dimension_numbers = #tpu.dot_dimension_numbers<[1], [0], [0], [1], [0, 0, 1, 1], [], []>} : vector<8x32xbf16>, vector<32x32xbf16>, vector<8x32xf32> -> vector<8x32xf32>
    %c0_21 = arith.constant 0 : index
    %c0_22 = arith.constant 0 : index
    %54 = vector.load %arg8[%c0_21, %c0_22] : memref<1x32xf32, #tpu.memory_space<vmem>>, vector<1x32xf32>
    %55 = vector.broadcast %54 : vector<1x32xf32> to vector<8x32xf32>
    %56 = arith.addf %53, %55 : vector<8x32xf32>
    %c0_23 = arith.constant 0 : index
    %c0_24 = arith.constant 0 : index
    %57 = vector.load %arg9[%c0_23, %c0_24] : memref<32x64xbf16, #tpu.memory_space<vmem>>, vector<32x64xbf16>
    %cst_25 = arith.constant dense<0.000000e+00> : vector<8x64xf32>
    %58 = tpu.matmul %51, %57, %cst_25 {dimension_numbers = #tpu.dot_dimension_numbers<[1], [0], [0], [1], [0, 0, 1, 1], [], []>} : vector<8x32xbf16>, vector<32x64xbf16>, vector<8x64xf32> -> vector<8x64xf32>
    %c0_26 = arith.constant 0 : index
    %c0_27 = arith.constant 0 : index
    %59 = vector.load %arg10[%c0_26, %c0_27] : memref<1x64xf32, #tpu.memory_space<vmem>>, vector<1x64xf32>
    %60 = vector.broadcast %59 : vector<1x64xf32> to vector<8x64xf32>
    %61 = arith.addf %58, %60 : vector<8x64xf32>
    %c0_28 = arith.constant 0 : index
    %c0_29 = arith.constant 0 : index
    %c0_30 = arith.constant 0 : index
    %c0_31 = arith.constant 0 : index
    %62 = vector.load %arg4[%c0_28, %c0_29, %c0_30, %c0_31] : memref<1x1x8x8xi32, #tpu.memory_space<vmem>>, vector<1x1x8x8xi32>
    %63 = vector.shape_cast %62 : vector<1x1x8x8xi32> to vector<8x8xi32>
    %c0_32 = arith.constant 0 : index
    %c0_33 = arith.constant 0 : index
    %64 = vector.load %arg11[%c0_32, %c0_33] : memref<32x32xbf16, #tpu.memory_space<vmem>>, vector<32x32xbf16>
    %c0_i32 = arith.constant 0 : i32
    %65 = vector.broadcast %c0_i32 : i32 to vector<8x8xi32>
    %66 = arith.cmpi eq, %63, %65 : vector<8x8xi32>
    %cst_34 = arith.constant -1.000000e+09 : f32
    %cst_35 = arith.constant 0.000000e+00 : f32
    %67 = vector.broadcast %cst_34 : f32 to vector<8x8xf32>
    %68 = vector.broadcast %cst_35 : f32 to vector<8x8xf32>
    %69 = arith.select %66, %67, %68 : vector<8x8xi1>, vector<8x8xf32>
    %70 = arith.truncf %56 : vector<8x32xf32> to vector<8x32xbf16>
    %71 = vector.extract_strided_slice %61 {offsets = [0, 0], sizes = [8, 32], strides = [1, 1]} : vector<8x64xf32> to vector<8x32xf32>
    %72 = arith.truncf %71 : vector<8x32xf32> to vector<8x32xbf16>
    %73 = vector.extract_strided_slice %61 {offsets = [0, 32], sizes = [8, 32], strides = [1, 1]} : vector<8x64xf32> to vector<8x32xf32>
    %74 = arith.truncf %73 : vector<8x32xf32> to vector<8x32xbf16>
    %75 = vector.extract_strided_slice %70 {offsets = [0, 0], sizes = [8, 8], strides = [1, 1]} : vector<8x32xbf16> to vector<8x8xbf16>
    %76 = vector.extract_strided_slice %72 {offsets = [0, 0], sizes = [8, 8], strides = [1, 1]} : vector<8x32xbf16> to vector<8x8xbf16>
    %77 = tpu.transpose %76, [1, 0] : vector<8x8xbf16> -> vector<8x8xbf16>
    %cst_36 = arith.constant dense<0.000000e+00> : vector<8x8xf32>
    %78 = tpu.matmul %75, %77, %cst_36 {dimension_numbers = #tpu.dot_dimension_numbers<[1], [0], [0], [1], [0, 0, 1, 1], [], []>} : vector<8x8xbf16>, vector<8x8xbf16>, vector<8x8xf32> -> vector<8x8xf32>
    %cst_37 = arith.constant 0.353553385 : f32
    %79 = vector.broadcast %cst_37 : f32 to vector<8x8xf32>
    %80 = arith.mulf %78, %79 : vector<8x8xf32>
    %81 = arith.addf %80, %69 : vector<8x8xf32>
    %cst_38 = arith.constant dense<0xFF800000> : vector<8xf32>
    %82 = vector.multi_reduction <maximumf>, %81, %cst_38 [1] : vector<8x8xf32> to vector<8xf32>
    %83 = vector.shape_cast %82 : vector<8xf32> to vector<8x1xf32>
    %84 = vector.broadcast %83 : vector<8x1xf32> to vector<8x8xf32>
    %85 = arith.subf %81, %84 : vector<8x8xf32>
    %86 = math.exp %85 : vector<8x8xf32>
    %cst_39 = arith.constant dense<0.000000e+00> : vector<8xf32>
    %87 = vector.multi_reduction <add>, %86, %cst_39 [1] : vector<8x8xf32> to vector<8xf32>
    %88 = vector.shape_cast %87 : vector<8xf32> to vector<8x1xf32>
    %89 = vector.broadcast %88 : vector<8x1xf32> to vector<8x8xf32>
    %90 = arith.divf %86, %89 : vector<8x8xf32>
    %91 = arith.truncf %90 : vector<8x8xf32> to vector<8x8xbf16>
    %92 = vector.extract_strided_slice %74 {offsets = [0, 0], sizes = [8, 8], strides = [1, 1]} : vector<8x32xbf16> to vector<8x8xbf16>
    %cst_40 = arith.constant dense<0.000000e+00> : vector<8x8xf32>
    %93 = tpu.matmul %91, %92, %cst_40 {dimension_numbers = #tpu.dot_dimension_numbers<[1], [0], [0], [1], [0, 0, 1, 1], [], []>} : vector<8x8xbf16>, vector<8x8xbf16>, vector<8x8xf32> -> vector<8x8xf32>
    %94 = vector.extract_strided_slice %70 {offsets = [0, 8], sizes = [8, 8], strides = [1, 1]} : vector<8x32xbf16> to vector<8x8xbf16>
    %95 = vector.extract_strided_slice %72 {offsets = [0, 8], sizes = [8, 8], strides = [1, 1]} : vector<8x32xbf16> to vector<8x8xbf16>
    %96 = tpu.transpose %95, [1, 0] : vector<8x8xbf16> -> vector<8x8xbf16>
    %cst_41 = arith.constant dense<0.000000e+00> : vector<8x8xf32>
    %97 = tpu.matmul %94, %96, %cst_41 {dimension_numbers = #tpu.dot_dimension_numbers<[1], [0], [0], [1], [0, 0, 1, 1], [], []>} : vector<8x8xbf16>, vector<8x8xbf16>, vector<8x8xf32> -> vector<8x8xf32>
    %cst_42 = arith.constant 0.353553385 : f32
    %98 = vector.broadcast %cst_42 : f32 to vector<8x8xf32>
    %99 = arith.mulf %97, %98 : vector<8x8xf32>
    %100 = arith.addf %99, %69 : vector<8x8xf32>
    %cst_43 = arith.constant dense<0xFF800000> : vector<8xf32>
    %101 = vector.multi_reduction <maximumf>, %100, %cst_43 [1] : vector<8x8xf32> to vector<8xf32>
    %102 = vector.shape_cast %101 : vector<8xf32> to vector<8x1xf32>
    %103 = vector.broadcast %102 : vector<8x1xf32> to vector<8x8xf32>
    %104 = arith.subf %100, %103 : vector<8x8xf32>
    %105 = math.exp %104 : vector<8x8xf32>
    %cst_44 = arith.constant dense<0.000000e+00> : vector<8xf32>
    %106 = vector.multi_reduction <add>, %105, %cst_44 [1] : vector<8x8xf32> to vector<8xf32>
    %107 = vector.shape_cast %106 : vector<8xf32> to vector<8x1xf32>
    %108 = vector.broadcast %107 : vector<8x1xf32> to vector<8x8xf32>
    %109 = arith.divf %105, %108 : vector<8x8xf32>
    %110 = arith.truncf %109 : vector<8x8xf32> to vector<8x8xbf16>
    %111 = vector.extract_strided_slice %74 {offsets = [0, 8], sizes = [8, 8], strides = [1, 1]} : vector<8x32xbf16> to vector<8x8xbf16>
    %cst_45 = arith.constant dense<0.000000e+00> : vector<8x8xf32>
    %112 = tpu.matmul %110, %111, %cst_45 {dimension_numbers = #tpu.dot_dimension_numbers<[1], [0], [0], [1], [0, 0, 1, 1], [], []>} : vector<8x8xbf16>, vector<8x8xbf16>, vector<8x8xf32> -> vector<8x8xf32>
    %113 = vector.extract_strided_slice %70 {offsets = [0, 16], sizes = [8, 8], strides = [1, 1]} : vector<8x32xbf16> to vector<8x8xbf16>
    %114 = vector.extract_strided_slice %72 {offsets = [0, 16], sizes = [8, 8], strides = [1, 1]} : vector<8x32xbf16> to vector<8x8xbf16>
    %115 = tpu.transpose %114, [1, 0] : vector<8x8xbf16> -> vector<8x8xbf16>
    %cst_46 = arith.constant dense<0.000000e+00> : vector<8x8xf32>
    %116 = tpu.matmul %113, %115, %cst_46 {dimension_numbers = #tpu.dot_dimension_numbers<[1], [0], [0], [1], [0, 0, 1, 1], [], []>} : vector<8x8xbf16>, vector<8x8xbf16>, vector<8x8xf32> -> vector<8x8xf32>
    %cst_47 = arith.constant 0.353553385 : f32
    %117 = vector.broadcast %cst_47 : f32 to vector<8x8xf32>
    %118 = arith.mulf %116, %117 : vector<8x8xf32>
    %119 = arith.addf %118, %69 : vector<8x8xf32>
    %cst_48 = arith.constant dense<0xFF800000> : vector<8xf32>
    %120 = vector.multi_reduction <maximumf>, %119, %cst_48 [1] : vector<8x8xf32> to vector<8xf32>
    %121 = vector.shape_cast %120 : vector<8xf32> to vector<8x1xf32>
    %122 = vector.broadcast %121 : vector<8x1xf32> to vector<8x8xf32>
    %123 = arith.subf %119, %122 : vector<8x8xf32>
    %124 = math.exp %123 : vector<8x8xf32>
    %cst_49 = arith.constant dense<0.000000e+00> : vector<8xf32>
    %125 = vector.multi_reduction <add>, %124, %cst_49 [1] : vector<8x8xf32> to vector<8xf32>
    %126 = vector.shape_cast %125 : vector<8xf32> to vector<8x1xf32>
    %127 = vector.broadcast %126 : vector<8x1xf32> to vector<8x8xf32>
    %128 = arith.divf %124, %127 : vector<8x8xf32>
    %129 = arith.truncf %128 : vector<8x8xf32> to vector<8x8xbf16>
    %130 = vector.extract_strided_slice %74 {offsets = [0, 16], sizes = [8, 8], strides = [1, 1]} : vector<8x32xbf16> to vector<8x8xbf16>
    %cst_50 = arith.constant dense<0.000000e+00> : vector<8x8xf32>
    %131 = tpu.matmul %129, %130, %cst_50 {dimension_numbers = #tpu.dot_dimension_numbers<[1], [0], [0], [1], [0, 0, 1, 1], [], []>} : vector<8x8xbf16>, vector<8x8xbf16>, vector<8x8xf32> -> vector<8x8xf32>
    %132 = vector.extract_strided_slice %70 {offsets = [0, 24], sizes = [8, 8], strides = [1, 1]} : vector<8x32xbf16> to vector<8x8xbf16>
    %133 = vector.extract_strided_slice %72 {offsets = [0, 24], sizes = [8, 8], strides = [1, 1]} : vector<8x32xbf16> to vector<8x8xbf16>
    %134 = tpu.transpose %133, [1, 0] : vector<8x8xbf16> -> vector<8x8xbf16>
    %cst_51 = arith.constant dense<0.000000e+00> : vector<8x8xf32>
    %135 = tpu.matmul %132, %134, %cst_51 {dimension_numbers = #tpu.dot_dimension_numbers<[1], [0], [0], [1], [0, 0, 1, 1], [], []>} : vector<8x8xbf16>, vector<8x8xbf16>, vector<8x8xf32> -> vector<8x8xf32>
    %cst_52 = arith.constant 0.353553385 : f32
    %136 = vector.broadcast %cst_52 : f32 to vector<8x8xf32>
    %137 = arith.mulf %135, %136 : vector<8x8xf32>
    %138 = arith.addf %137, %69 : vector<8x8xf32>
    %cst_53 = arith.constant dense<0xFF800000> : vector<8xf32>
    %139 = vector.multi_reduction <maximumf>, %138, %cst_53 [1] : vector<8x8xf32> to vector<8xf32>
    %140 = vector.shape_cast %139 : vector<8xf32> to vector<8x1xf32>
    %141 = vector.broadcast %140 : vector<8x1xf32> to vector<8x8xf32>
    %142 = arith.subf %138, %141 : vector<8x8xf32>
    %143 = math.exp %142 : vector<8x8xf32>
    %cst_54 = arith.constant dense<0.000000e+00> : vector<8xf32>
    %144 = vector.multi_reduction <add>, %143, %cst_54 [1] : vector<8x8xf32> to vector<8xf32>
    %145 = vector.shape_cast %144 : vector<8xf32> to vector<8x1xf32>
    %146 = vector.broadcast %145 : vector<8x1xf32> to vector<8x8xf32>
    %147 = arith.divf %143, %146 : vector<8x8xf32>
    %148 = arith.truncf %147 : vector<8x8xf32> to vector<8x8xbf16>
    %149 = vector.extract_strided_slice %74 {offsets = [0, 24], sizes = [8, 8], strides = [1, 1]} : vector<8x32xbf16> to vector<8x8xbf16>
    %cst_55 = arith.constant dense<0.000000e+00> : vector<8x8xf32>
    %150 = tpu.matmul %148, %149, %cst_55 {dimension_numbers = #tpu.dot_dimension_numbers<[1], [0], [0], [1], [0, 0, 1, 1], [], []>} : vector<8x8xbf16>, vector<8x8xbf16>, vector<8x8xf32> -> vector<8x8xf32>
    %151 = tpu.concatenate %93, %112, %131, %150 in 1 : vector<8x8xf32>, vector<8x8xf32>, vector<8x8xf32>, vector<8x8xf32> -> vector<8x32xf32>
    %152 = arith.truncf %151 : vector<8x32xf32> to vector<8x32xbf16>
    %cst_56 = arith.constant dense<0.000000e+00> : vector<8x32xf32>
    %153 = tpu.matmul %152, %64, %cst_56 {dimension_numbers = #tpu.dot_dimension_numbers<[1], [0], [0], [1], [0, 0, 1, 1], [], []>} : vector<8x32xbf16>, vector<32x32xbf16>, vector<8x32xf32> -> vector<8x32xf32>
    %154 = arith.addf %3, %153 : vector<8x32xf32>
    %c0_57 = arith.constant 0 : index
    %c0_58 = arith.constant 0 : index
    %155 = vector.load %arg12[%c0_57, %c0_58] : memref<1x32xf32, #tpu.memory_space<vmem>>, vector<1x32xf32>
    %156 = vector.broadcast %155 : vector<1x32xf32> to vector<8x32xf32>
    %157 = arith.addf %154, %156 : vector<8x32xf32>
    %c0_59 = arith.constant 0 : index
    %c0_60 = arith.constant 0 : index
    %c0_61 = arith.constant 0 : index
    %158 = vector.load %arg13[%c0_59, %c0_60, %c0_61] : memref<1x8x32xf32, #tpu.memory_space<vmem>>, vector<1x8x32xf32>
    %159 = vector.shape_cast %158 : vector<1x8x32xf32> to vector<8x32xf32>
    %160 = vector.shape_cast %157 : vector<8x32xf32> to vector<1x8x32xf32>
    tpu.vector_store %arg13[%c0_59, %c0_60, %c0_61], %160 {strides = array<i32>} : memref<1x8x32xf32, #tpu.memory_space<vmem>>, vector<1x8x32xf32>,
    return
  }
  func.func @transform_0(%arg0: i32, %arg1: i32) -> (i32, i32, i32) {
    %c0_i32 = arith.constant 0 : i32
    %c0_i32_0 = arith.constant 0 : i32
    return %arg0, %arg1, %c0_i32 : i32, i32, i32
  }
  func.func @transform_1(%arg0: i32, %arg1: i32) -> (i32, i32, i32) {
    %c0_i32 = arith.constant 0 : i32
    %c0_i32_0 = arith.constant 0 : i32
    %c0_i32_1 = arith.constant 0 : i32
    return %arg0, %c0_i32, %c0_i32_0 : i32, i32, i32
  }
  func.func @transform_2(%arg0: i32, %arg1: i32) -> (i32, i32, i32, i32) {
    %c0_i32 = arith.constant 0 : i32
    %c0_i32_0 = arith.constant 0 : i32
    %c0_i32_1 = arith.constant 0 : i32
    return %arg0, %c0_i32, %arg1, %c0_i32_0 : i32, i32, i32, i32
  }
  func.func @transform_3(%arg0: i32, %arg1: i32) -> (i32, i32) {
    %c0_i32 = arith.constant 0 : i32
    %c0_i32_0 = arith.constant 0 : i32
    %c0_i32_1 = arith.constant 0 : i32
    return %c0_i32, %c0_i32_0 : i32, i32
  }
  func.func @transform_4(%arg0: i32, %arg1: i32) -> (i32, i32) {
    %c0_i32 = arith.constant 0 : i32
    %c0_i32_0 = arith.constant 0 : i32
    %c0_i32_1 = arith.constant 0 : i32
    return %c0_i32, %c0_i32_0 : i32, i32
  }
  func.func @transform_5(%arg0: i32, %arg1: i32) -> (i32, i32) {
    %c0_i32 = arith.constant 0 : i32
    %c0_i32_0 = arith.constant 0 : i32
    %c0_i32_1 = arith.constant 0 : i32
    return %c0_i32, %c0_i32_0 : i32, i32
  }
  func.func @transform_6(%arg0: i32, %arg1: i32) -> (i32, i32) {
    %c0_i32 = arith.constant 0 : i32
    %c0_i32_0 = arith.constant 0 : i32
    %c0_i32_1 = arith.constant 0 : i32
    return %c0_i32, %c0_i32_0 : i32, i32
  }
  func.func @transform_7(%arg0: i32, %arg1: i32) -> (i32, i32) {
    %c0_i32 = arith.constant 0 : i32
    %c0_i32_0 = arith.constant 0 : i32
    %c0_i32_1 = arith.constant 0 : i32
    return %c0_i32, %c0_i32_0 : i32, i32
  }
  func.func @transform_8(%arg0: i32, %arg1: i32) -> (i32, i32) {
    %c0_i32 = arith.constant 0 : i32
    %c0_i32_0 = arith.constant 0 : i32
    %c0_i32_1 = arith.constant 0 : i32
    return %c0_i32, %c0_i32_0 : i32, i32
  }
  func.func @transform_9(%arg0: i32, %arg1: i32) -> (i32, i32) {
    %c0_i32 = arith.constant 0 : i32
    %c0_i32_0 = arith.constant 0 : i32
    %c0_i32_1 = arith.constant 0 : i32
    return %c0_i32, %c0_i32_0 : i32, i32
  }
  func.func @transform_10(%arg0: i32, %arg1: i32) -> (i32, i32) {
    %c0_i32 = arith.constant 0 : i32
    %c0_i32_0 = arith.constant 0 : i32
    %c0_i32_1 = arith.constant 0 : i32
    return %c0_i32, %c0_i32_0 : i32, i32
  }
  func.func @transform_11(%arg0: i32, %arg1: i32) -> (i32, i32, i32) {
    %c0_i32 = arith.constant 0 : i32
    %c0_i32_0 = arith.constant 0 : i32
    return %arg0, %arg1, %c0_i32 : i32, i32, i32
  }
}

module attributes {stable_mosaic.version = 11 : i64} {
  func.func @ffn_kernel(%arg0: i32, %arg1: memref<16x32xf32, #tpu.memory_space<vmem>>, %arg2: memref<1x32xf32, #tpu.memory_space<vmem>>, %arg3: memref<1x32xf32, #tpu.memory_space<vmem>>, %arg4: memref<32x64xbf16, #tpu.memory_space<vmem>>, %arg5: memref<1x64xf32, #tpu.memory_space<vmem>>, %arg6: memref<64x32xbf16, #tpu.memory_space<vmem>>, %arg7: memref<1x32xf32, #tpu.memory_space<vmem>>, %arg8: memref<16x32xf32, #tpu.memory_space<vmem>>) attributes {dimension_semantics = [#tpu.dimension_semantics<parallel>], iteration_bounds = array<i64: 1>, scalar_prefetch = 0 : i64, scratch_operands = 0 : i64, tpu.core_type = #tpu.core_type<tc>, window_params = [{transform_indices = @transform_0, window_bounds = array<i64: 16, 32>}, {pipeline_mode = #tpu.pipeline_mode<synchronous>, transform_indices = @transform_1, window_bounds = array<i64: 1, 32>}, {pipeline_mode = #tpu.pipeline_mode<synchronous>, transform_indices = @transform_2, window_bounds = array<i64: 1, 32>}, {pipeline_mode = #tpu.pipeline_mode<synchronous>, transform_indices = @transform_3, window_bounds = array<i64: 32, 64>}, {pipeline_mode = #tpu.pipeline_mode<synchronous>, transform_indices = @transform_4, window_bounds = array<i64: 1, 64>}, {pipeline_mode = #tpu.pipeline_mode<synchronous>, transform_indices = @transform_5, window_bounds = array<i64: 64, 32>}, {pipeline_mode = #tpu.pipeline_mode<synchronous>, transform_indices = @transform_6, window_bounds = array<i64: 1, 32>}, {transform_indices = @transform_7, window_bounds = array<i64: 16, 32>}]} {
    %c0 = arith.constant 0 : index
    %c0_0 = arith.constant 0 : index
    %0 = vector.load %arg1[%c0, %c0_0] : memref<16x32xf32, #tpu.memory_space<vmem>>, vector<16x32xf32>
    %c0_1 = arith.constant 0 : index
    %c0_2 = arith.constant 0 : index
    %1 = vector.load %arg2[%c0_1, %c0_2] : memref<1x32xf32, #tpu.memory_space<vmem>>, vector<1x32xf32>
    %c0_3 = arith.constant 0 : index
    %c0_4 = arith.constant 0 : index
    %2 = vector.load %arg3[%c0_3, %c0_4] : memref<1x32xf32, #tpu.memory_space<vmem>>, vector<1x32xf32>
    %cst = arith.constant dense<0.000000e+00> : vector<16xf32>
    %3 = vector.multi_reduction <add>, %0, %cst [1] : vector<16x32xf32> to vector<16xf32>
    %4 = vector.shape_cast %3 : vector<16xf32> to vector<16x1xf32>
    %cst_5 = arith.constant 3.200000e+01 : f32
    %5 = vector.broadcast %cst_5 : f32 to vector<16x1xf32>
    %6 = arith.divf %4, %5 : vector<16x1xf32>
    %7 = vector.broadcast %6 : vector<16x1xf32> to vector<16x32xf32>
    %8 = arith.subf %0, %7 : vector<16x32xf32>
    %9 = arith.mulf %8, %8 : vector<16x32xf32>
    %cst_6 = arith.constant dense<0.000000e+00> : vector<16xf32>
    %10 = vector.multi_reduction <add>, %9, %cst_6 [1] : vector<16x32xf32> to vector<16xf32>
    %11 = vector.shape_cast %10 : vector<16xf32> to vector<16x1xf32>
    %cst_7 = arith.constant 3.200000e+01 : f32
    %12 = vector.broadcast %cst_7 : f32 to vector<16x1xf32>
    %13 = arith.divf %11, %12 : vector<16x1xf32>
    %14 = vector.broadcast %6 : vector<16x1xf32> to vector<16x32xf32>
    %15 = arith.subf %0, %14 : vector<16x32xf32>
    %cst_8 = arith.constant 9.99999997E-7 : f32
    %16 = vector.broadcast %cst_8 : f32 to vector<16x1xf32>
    %17 = arith.addf %13, %16 : vector<16x1xf32>
    %18 = math.rsqrt %17 : vector<16x1xf32>
    %19 = vector.broadcast %18 : vector<16x1xf32> to vector<16x32xf32>
    %20 = arith.mulf %15, %19 : vector<16x32xf32>
    %21 = vector.broadcast %1 : vector<1x32xf32> to vector<16x32xf32>
    %22 = arith.mulf %20, %21 : vector<16x32xf32>
    %23 = vector.broadcast %2 : vector<1x32xf32> to vector<16x32xf32>
    %24 = arith.addf %22, %23 : vector<16x32xf32>
    %25 = arith.truncf %24 : vector<16x32xf32> to vector<16x32xbf16>
    %c0_9 = arith.constant 0 : index
    %c0_10 = arith.constant 0 : index
    %26 = vector.load %arg4[%c0_9, %c0_10] : memref<32x64xbf16, #tpu.memory_space<vmem>>, vector<32x64xbf16>
    %cst_11 = arith.constant dense<0.000000e+00> : vector<16x64xf32>
    %27 = tpu.matmul %25, %26, %cst_11 {dimension_numbers = #tpu.dot_dimension_numbers<[1], [0], [0], [1], [0, 0, 1, 1], [], []>} : vector<16x32xbf16>, vector<32x64xbf16>, vector<16x64xf32> -> vector<16x64xf32>
    %c0_12 = arith.constant 0 : index
    %c0_13 = arith.constant 0 : index
    %28 = vector.load %arg5[%c0_12, %c0_13] : memref<1x64xf32, #tpu.memory_space<vmem>>, vector<1x64xf32>
    %29 = vector.broadcast %28 : vector<1x64xf32> to vector<16x64xf32>
    %30 = arith.addf %27, %29 : vector<16x64xf32>
    %cst_14 = arith.constant 0.000000e+00 : f32
    %31 = vector.broadcast %cst_14 : f32 to vector<16x64xf32>
    %32 = arith.maximumf %30, %31 : vector<16x64xf32>
    %33 = arith.truncf %32 : vector<16x64xf32> to vector<16x64xbf16>
    %c0_15 = arith.constant 0 : index
    %c0_16 = arith.constant 0 : index
    %34 = vector.load %arg6[%c0_15, %c0_16] : memref<64x32xbf16, #tpu.memory_space<vmem>>, vector<64x32xbf16>
    %cst_17 = arith.constant dense<0.000000e+00> : vector<16x32xf32>
    %35 = tpu.matmul %33, %34, %cst_17 {dimension_numbers = #tpu.dot_dimension_numbers<[1], [0], [0], [1], [0, 0, 1, 1], [], []>} : vector<16x64xbf16>, vector<64x32xbf16>, vector<16x32xf32> -> vector<16x32xf32>
    %c0_18 = arith.constant 0 : index
    %c0_19 = arith.constant 0 : index
    %36 = vector.load %arg7[%c0_18, %c0_19] : memref<1x32xf32, #tpu.memory_space<vmem>>, vector<1x32xf32>
    %37 = vector.broadcast %36 : vector<1x32xf32> to vector<16x32xf32>
    %38 = arith.addf %35, %37 : vector<16x32xf32>
    %39 = arith.addf %0, %38 : vector<16x32xf32>
    %c0_20 = arith.constant 0 : index
    %c0_21 = arith.constant 0 : index
    %40 = vector.load %arg8[%c0_20, %c0_21] : memref<16x32xf32, #tpu.memory_space<vmem>>, vector<16x32xf32>
    tpu.vector_store %arg8[%c0_20, %c0_21], %39 {strides = array<i32>} : memref<16x32xf32, #tpu.memory_space<vmem>>, vector<16x32xf32>,
    return
  }
  func.func @transform_0(%arg0: i32) -> (i32, i32) {
    %c0_i32 = arith.constant 0 : i32
    %c0_i32_0 = arith.constant 0 : i32
    return %arg0, %c0_i32 : i32, i32
  }
  func.func @transform_1(%arg0: i32) -> (i32, i32) {
    %c0_i32 = arith.constant 0 : i32
    %c0_i32_0 = arith.constant 0 : i32
    %c0_i32_1 = arith.constant 0 : i32
    return %c0_i32, %c0_i32_0 : i32, i32
  }
  func.func @transform_2(%arg0: i32) -> (i32, i32) {
    %c0_i32 = arith.constant 0 : i32
    %c0_i32_0 = arith.constant 0 : i32
    %c0_i32_1 = arith.constant 0 : i32
    return %c0_i32, %c0_i32_0 : i32, i32
  }
  func.func @transform_3(%arg0: i32) -> (i32, i32) {
    %c0_i32 = arith.constant 0 : i32
    %c0_i32_0 = arith.constant 0 : i32
    %c0_i32_1 = arith.constant 0 : i32
    return %c0_i32, %c0_i32_0 : i32, i32
  }
  func.func @transform_4(%arg0: i32) -> (i32, i32) {
    %c0_i32 = arith.constant 0 : i32
    %c0_i32_0 = arith.constant 0 : i32
    %c0_i32_1 = arith.constant 0 : i32
    return %c0_i32, %c0_i32_0 : i32, i32
  }
  func.func @transform_5(%arg0: i32) -> (i32, i32) {
    %c0_i32 = arith.constant 0 : i32
    %c0_i32_0 = arith.constant 0 : i32
    %c0_i32_1 = arith.constant 0 : i32
    return %c0_i32, %c0_i32_0 : i32, i32
  }
  func.func @transform_6(%arg0: i32) -> (i32, i32) {
    %c0_i32 = arith.constant 0 : i32
    %c0_i32_0 = arith.constant 0 : i32
    %c0_i32_1 = arith.constant 0 : i32
    return %c0_i32, %c0_i32_0 : i32, i32
  }
  func.func @transform_7(%arg0: i32) -> (i32, i32) {
    %c0_i32 = arith.constant 0 : i32
    %c0_i32_0 = arith.constant 0 : i32
    return %arg0, %c0_i32 : i32, i32
  }
}

</mosaic_0001>

<bundles_post_ra>
// kernel: _lambda_.4
= control target key start
LH: loop header
LB: loop body
LE: loop exit
PB: predicated region body
PF: predicated region fallthrough
CT: control target
= control target key end

     0   :  { %s2094_s0 = inlined_call_operand.vmem [shape: f32[2,8,32], index: 0, kind: input, shape index: {}]   ;;  %s2095_s1 = inlined_call_operand.hbm [shape: f32[2,16,32], index: 1, kind: input, shape index: {}]   ;;  %s2096_s2 = inlined_call_operand.hbm [shape: s32[2,1,8,16], index: 2, kind: input, shape index: {}]   ;;  %s2097_s3 = inlined_call_operand.vmem [shape: f32[1,32], index: 3, kind: input, shape index: {}]   ;;  %s2098_s4 = inlined_call_operand.vmem [shape: f32[1,32], index: 4, kind: input, shape index: {}, may-alias: {4,6,10}]   ;;  %s2099_s5 = inlined_call_operand.hbm [shape: bf16[32,32], index: 5, kind: input, shape index: {}]   ;;  %s2100_s6 = inlined_call_operand.vmem [shape: f32[1,32], index: 6, kind: input, shape index: {}, may-alias: {4,6,10}]   ;;  %s2101_s7 = inlined_call_operand.hbm [shape: bf16[32,64], index: 7, kind: input, shape index: {}]   ;;  %s2102_s8 = inlined_call_operand.vmem [shape: f32[1,64], index: 8, kind: input, shape index: {}]   ;;  %s2103_s9 = inlined_call_operand.hbm [shape: bf16[32,32], index: 9, kind: input, shape index: {}]   ;;  %s2104_s10 = inlined_call_operand.vmem [shape: f32[1,32], index: 10, kind: input, shape index: {}, may-alias: {4,6,10}]   ;;  %s2105_s11 = inlined_call_operand.vmem [shape: f32[2,8,32], index: 11, kind: output, shape index: {0}]   ;;  %s2106_s12 = inlined_call_operand.hbm [shape: f32[2,4,8,16], index: 12, kind: output, shape index: {1}]  }
   0x1   :  { %2112 = sst [smem:[#allocation22_spill]] %s2095_s1 }
   0x2   :  { %2113 = sst [smem:[#allocation23_spill]] %s2099_s5 }
   0x3   :  { %2114 = sst [smem:[#allocation24_spill]] %s2101_s7 }
   0x4   :  { %2115 = sst [smem:[#allocation25_spill]] %s2103_s9 }
   0x5   :  { %2116 = sst [smem:[#allocation26_spill]] %s2104_s10 }
   0x6   :  { %2117 = sst [smem:[#allocation27_spill]] %s2105_s11 }
   0x7   :  { %2118 = sst [smem:[#allocation28_spill]] %s2106_s12 }
   0x8   :  { %18 = vsyncpa [#allocation3], 0 }
   0x9   :  { %20 = vsyncpa [#allocation3 + $0x1], 0 }
   0xa   :  { %21 = vsyncpa [#allocation6], 0 }
   0xb   :  { %23 = vsyncpa [#allocation6 + $0x1], 0 }
   0xc   :  { %24 = vsyncpa [#allocation9], 0 }
   0xd   :  { %25 = vsyncpa [#allocation4], 0 }
   0xe   :  { %27 = vsyncpa [#allocation4 + $0x1], 0  ;;  %s1807_s21 = smov 0   ;;  %s1809_s22 = smov 0  }
   0xf   :  { %s1811_s23 = smov 0   ;;  %s1813_s24 = smov 0  }
  0x10   :  { %s1815_s25 = smov 0   ;;  %s1817_s26 = smov 0  }
  0x11 LB: > { %2119 = sst [smem:[#allocation17_spill]] %s1700_s21  ;;  %s1838_s27 = sadd.s32 4294967295, %s1720_s26   ;;  %s1720_s26 = sphi %s1817_s26, %s33_s26   ;;  %s1716_s25 = sphi %s1815_s25, %s2146_s25   ;;  %s1712_s24 = sphi %s1813_s24, %s2145_s24   ;;  %s1708_s23 = sphi %s1811_s23, %s2141_s23   ;;  %s1704_s22 = sphi %s1809_s22, %s2144_s22   ;;  %s1700_s21 = sphi %s1807_s21, %s2143_s21  }
  0x12   : > { %2120 = sst [smem:[#allocation18_spill]] %s1708_s23  ;;  %s1265_s28 = sadd.s32 4294967294, %s1720_s26  }
  0x13   : > { %p93_p0 = scmp.ne.s32.totalorder %s1704_s22, %s1700_s21  ;;  %p94_p1 = scmp.eq.s32.totalorder %s1838_s27, 0 }
  0x14   : > { %p343_p2 = scmp.eq.s32.totalorder %s1838_s27, 1  ;;  %p349_p3 = scmp.eq.s32.totalorder %s1265_s28, 1 }
  0x15   : > { %p1847_p4 = por %p94_p1, %p93_p0  ;;  %p1266_p5 = scmp.ge.s32.totalorder %s1720_s26, 1 }
  0x16   : > { %p1852_p6 = por %p349_p3, %p93_p0  ;;  %p356_p7 = scmp.lt.s32.totalorder %s1720_s26, 3 }
  0x17   : > { %s2124_s5 = sld [smem:[#allocation23_spill]]  ;;  %s1722_s17 = smov [#allocation7]  }
  0x18   : > { %s2122_s30 = scalar_select %p1852_p6, 1, 0 }
  0x19   : > { %p1860_p8 = pnand %p1266_p5, %p356_p7  ;;  %s375_s18 = sshll.u32 %s1722_s17, 4  ;;  %s376_s18 = int_to_ptr.vmem [resolvable:$true] %s375_s18 }
  0x1a   : > { %2123 = sst [smem:[#allocation19_spill]] %s2122_s30  ;;  %p1270_p11 = scmp.ge.s32.totalorder %s1720_s26, 2 }
  0x1b   : > { %p1354_p9 = pneg %p1860_p8  ;;  %s2127_s7 = sld [smem:[#allocation24_spill]] }
  0x1c   : > { %s1723_s14 = smov 64   ;;  %s1724_s17 = smov 4  }
  0x1d   : > { %s373_s15 = sshll.u32 %s2124_s5, 4  ;;  %p1868_p10 = pnand %p1354_p9, %p94_p1  ;;  %s374_s15 = int_to_ptr.hbm [resolvable:$true] %s373_s15 }
  0x1e   : > { %s1725_s5 = smov [#allocation8]   ;;  %s2128_s9 = sld [smem:[#allocation25_spill]] }
  0x1f   : > { %1357 = dma.hbm_to_vmem [thread:$0]  (!%p1868_p10), %s374_s15, 256, %s376_s18, [#allocation6], %s1723_s14, %s1723_s14, %s1724_s17  }
  0x20   : > { %s392_s30 = sshll.u32 %s1725_s5, 4  ;;  %s1726_s20 = smov [#allocation10]   ;;  %s393_s30 = int_to_ptr.vmem [resolvable:$true] %s392_s30 }
  0x21   : > { %s390_s13 = sshll.u32 %s2127_s7, 4  ;;  %s409_s28 = sshll.u32 %s1726_s20, 4  ;;  %s391_s13 = int_to_ptr.hbm [resolvable:$true] %s390_s13  ;;  %s410_s28 = int_to_ptr.vmem [resolvable:$true] %s409_s28 }
  0x22   : > { %1360 = dma.hbm_to_vmem [thread:$0]  (!%p1868_p10), %s391_s13, 256, %s393_s30, [#allocation9], %s1723_s14, %s1723_s14, %s1724_s17  }
  0x23   : > { %s45_s5 = sadd.s32 1, %s1716_s25  ;;  %s80_s15 = sadd.s32 1, %s1708_s23 }
  0x24   : > { %s407_s10 = sshll.u32 %s2128_s9, 4  ;;  %p47_p12 = scmp.ge.s32.totalorder %s45_s5, 2  ;;  %s408_s10 = int_to_ptr.hbm [resolvable:$true] %s407_s10 }
  0x25   : > { %1363 = dma.hbm_to_vmem [thread:$0]  (!%p1868_p10), %s408_s10, 256, %s410_s28, [#allocation9], %s1723_s14, %s1723_s14, %s1724_s17  }
  0x26   : > { %p87_p13 = scmp.ne.s32.totalorder %s1708_s23, %s1704_s22  ;;  %p88_p0 = scmp.eq.s32.totalorder %s1720_s26, 0 }
  0x27   : > { %s2148_s5 = smov (%p47_p12, %s45_s5), 0  ;;  %p1378_p7 = scmp.lt.s32.totalorder %s1720_s26, 2 }
  0x28   : > { %2129 = sst [smem:[#allocation20_spill]] %s2148_s5  ;;  %p1892_p3 = por %p88_p0, %p87_p13 }
  0x29   : > { %p1898_p5 = por %p343_p2, %p87_p13  ;;  %s77_s10 = ssub.s32 %s1716_s25, %s2148_s5 }
  0x2a   : > { %p78_p9 = scmp.eq.s32.totalorder %s77_s10, 0  ;;  %s436_s30 = sand.u32 1, %s1708_s23  }
  0x2b   : > { %s1271_s18 = sshll.u32 %s436_s30, 4  ;;  %s1328_s13 = sshll.u32 %s1716_s25, 4 }
  0x2c   : > { %s1907_s19 = scalar_select %p78_p9, %s1708_s23, %s80_s15  }
  0x2d   : > { %s2133_s1 = sld [smem:[#allocation22_spill]]  ;;  %s440_s28 = scalar_lea.vmem [#allocation2], %s1271_s18 }
  0x2e   : > { %2132 = sst [smem:[#allocation21_spill]] %s1907_s19  ;;  %s448_s7 = sshll.u32 %s440_s28, 4  ;;  %s449_s7 = int_to_ptr.vmem [resolvable:$true] %s448_s7 }
  0x2f   : > { %p1915_p2 = pnand %p1378_p7, %p1892_p3  ;;  %s458_s10 = sand.u32 1, %s1720_s26  }
  0x30   : > { %s437_s15 = scalar_lea.sflag [#allocation3], %s436_s30  ;;  %s1727_s19 = smov 128  }
  0x31   : > { %s1728_s23 = smov 8   ;;  %s1274_s14 = sshll.u32 %s436_s30, 3 }
  0x32   : > { %s462_s28 = scalar_lea.vmem [#allocation5], %s1274_s14  ;;  %s459_s12 = scalar_lea.sflag [#allocation6], %s458_s10 }
  0x33   : > { %s445_s20 = scalar_lea.hbm %s2133_s1, %s1328_s13  ;;  %s1275_s13 = sshll.u32 %s1716_s25, 3 }
  0x34   : > { %s446_s9 = sshll.u32 %s445_s20, 4  ;;  %s467_s20 = scalar_lea.hbm %s2096_s2, %s1275_s13  ;;  %s447_s9 = int_to_ptr.hbm [resolvable:$true] %s446_s9 }
  0x35   : > { %1367 = dma.hbm_to_vmem [thread:$0]  (!%p1915_p2), %s447_s9, 256, %s449_s7, %s437_s15, %s1727_s19, %s1727_s19, %s1728_s23  }
  0x36   : > { %s471_s11 = sshll.u32 %s462_s28, 4  ;;  %s469_s1 = sshll.u32 %s467_s20, 4  ;;  %s472_s11 = int_to_ptr.vmem [resolvable:$true] %s471_s11  ;;  %s470_s1 = int_to_ptr.hbm [resolvable:$true] %s469_s1 }
  0x37   : > { %1370 = dma.hbm_to_vmem [thread:$0]  (!%p1915_p2), %s470_s1, 128, %s472_s11, %s459_s12  }
  0x38   : > { %480 = sbr.rel (%p1860_p8) target bundleno = 1696 (0x6a0), region = 64  ;;  %s1931_s7 = sand.u32 (!%p1860_p8), 1, %s1704_s22  }
  0x39   : > { %s1277_s9 = sshll.u32 (!%p1860_p8), %s1931_s7, 4  ;;  %s483_s23 = scalar_lea.sflag (!%p1860_p8), [#allocation3], %s1931_s7 }
  0x3a   : > { %s486_s30 = scalar_lea.vmem (!%p1860_p8), [#allocation2], %s1277_s9 }
  0x3d   : > { %1679 = dma.done.wait (%p1847_p4), %s483_s23, 256  }
  0x3e   : > { %1681 = vsyncadd (%p1847_p4), %s483_s23, 4294967040  ;;  %s492_s1 = sand.u32 1, %s1838_s27   ;;  %s1278_s12 = sshll.u32 %s1931_s7, 3 }
  0x3f   : > { %s493_s16 = scalar_lea.sflag [#allocation6], %s492_s1  ;;  %s1941_s5 = scalar_lea.vmem [#allocation5], %s1278_s12 }
  0x40   : > { %1683 = dma.done.wait (%p1847_p4), %s493_s16, 128  }
  0x41   : > { %1685 = vsyncadd (%p1847_p4), %s493_s16, 4294967168 }
  0x42   : > { %1687 = dma.done.wait (%p94_p1), [#allocation6], 256  }
  0x43   : > { %1689 = vsyncadd (%p94_p1), [#allocation6], 4294967040 }
  0x44   : > { %1691 = dma.done.wait (%p94_p1), [#allocation9], 512  }
  0x45   : > { %1693 = vsyncadd (%p94_p1), [#allocation9], 4294966784  ;;  %p572_p8 = scmp.lt.s32.totalorder %s1712_s24, 1  ;;  %vm590_vm0 = vcmask 261120   ;;  %v1729_v2 = vmov 32.0   ;;  %v1332_v3 = vld [vmem:[#allocation8 + $0x8] sm:$0xff] }
  0x46   : > { %1456 = vrcp.f32 %v1729_v2  ;;  %697 = vmatpush.bf16.msra.mxu1 %v1332_v3  ;;  %v1331_v4 = vld [vmem:[#allocation8] sm:$0xff]  ;;  %v630_v6 = vld [vmem:[%s486_s30 + $0x8] sm:$0xff]  ;;  %v1329_v20 = vld [vmem:[#allocation7] sm:$0xff]  ;;  %vm720_vm2 = vcmask 64512   ;;  %s1730_s18 = smov 96   ;;  %s1731_s9 = smov 120  }
  0x47   : > { %s1957_s19 = scalar_select %p572_p8, %s1712_s24, 1  ;;  %v629_v5 = vld [vmem:[%s486_s30] sm:$0xff]  ;;  %v1330_v19 = vld [vmem:[#allocation7 + $0x8] sm:$0xff]  ;;  %v1734_v60 = vmov 0.0   ;;  %vm742_vm7 = vcmask 130048  }
  0x48   : > { %v631_v8 = vpack.c.bf16 %v630_v6, %v629_v5  ;;  %661 = vmatpush.bf16.msra.mxu0 %v1330_v19  ;;  %v1453_v21 = vld [vmem:[%s2102_s8] ss:$0 sm:$0xff]  ;;  %s1732_s23 = smov 104   ;;  %s1733_s12 = smov 112  }
  0x49   : > { %s1283_s29 = sshll.u32 %s1957_s19, 3  ;;  %v1451_v41 = vld [vmem:[%s2097_s3] ss:$0 sm:$0xff]  ;;  %s1282_s16 = sshll.u32 %s1931_s7, 5 }
  0x4a   : > { %s578_s14 = scalar_lea.vmem %s2094_s0, %s1283_s29  ;;  %698 = vmatpush.bf16.msra.mxu1 %v1331_v4  ;;  %v1452_v44 = vld [vmem:[%s2098_s4] ss:$0 sm:$0xff]  ;;  %s1735_s10 = smov 80  }
  0x4b   : > { %v1965_v0 = vld [vmem:[%s578_s14] sm:$0xff]  ;;  %s1736_s15 = smov 88   ;;  %s1737_s14 = smov 72  }
  0x4c   : > { %v591_v1 = vsel %vm590_vm0, %v1965_v0, 0.0  ;;  %v1457_v7 = vpop.eup %1456  ;;  %662 = vmatpush.bf16.msra.mxu0 %v1329_v20  ;;  %v1454_v51 = vld [vmem:[%s2100_s6] ss:$0 sm:$0xff]  ;;  %s1738_s27 = smov 16   ;;  %s1739_s13 = smov 8  }
  0x4d   : > { %592 = vadd.xlane.f32.xlu0 %v591_v1  ;;  %v595_v9 = vmul.f32 32.0, %v1457_v7  ;;  %1302 = vmatmul.msk.bf16.vlgmr.msra.gmra.mxu1 %vm590_vm0, %v631_v8  ;;  %vm599_vm1 = vweird.f32 %v1457_v7  ;;  %v705_v58 = vld [vmem:[%s1941_s5] sm:$0xff]  ;;  %s2002_s5 = scalar_lea.vmem [#allocation11], %s1282_s16  ;;  %s1335_s17 = sshll.u32 %s1712_s24, 5 }
  0x4e   : > { %vm710_vm6 = vcmp.eq.s32.totalorder %v705_v58, 0  ;;  %s2135_s11 = sld [smem:[#allocation28_spill]]  ;;  %s1064_s1 = scalar_lea.sflag [#allocation4], %s1931_s7 }
  0x4f   : > { %v596_v10 = vsub.f32 1.0, %v595_v9  ;;  %v1995_v61 = vsel %vm710_vm6, -1e+09, %v1734_v60 }
  0x51   : > { %v597_v11 = vmul.f32 %v1457_v7, %v596_v10 }
  0x53   : > { %v598_v12 = vadd.f32 %v1457_v7, %v597_v11 }
  0x54   : > { %s1646_s24 = scalar_lea.hbm %s2135_s11, 64 }
  0x55   : > { %v600_v13 = vsel %vm599_vm1, %v1457_v7, %v598_v12 }
  0xc0   : > { %v593_v14 = vpop.xlane.xlu0 %592 }
  0xc1   : > { %v601_v15 = vmul.f32 %v600_v13, %v593_v14 }
  0xc3   : > { %v602_v16 = vsub.f32 %v1965_v0, %v601_v15 }
  0xc5   : > { %v603_v17 = vmul.f32 %v602_v16, %v602_v16 }
  0xc7   : > { %v604_v18 = vsel %vm590_vm0, %v603_v17, 0.0 }
  0xc8   : > { %605 = vadd.xlane.f32.xlu0 %v604_v18 }
  0xca   : > { %v700_v22 = vpop.f32.mrf.mxu1 }
  0xcb   : > { %v701_v25 = vadd.f32 %v1453_v21, %v700_v22 }
  0xcd   : > { %v713_v27 = vpack.c.bf16 %v701_v25, %v701_v25 }
  0xcf   : > { %v717_v30 = vunpack.c.l.b16 %v713_v27 }
  0xd2   : > { %v702_v28 = vpop.f32.mrf.mxu1 }
  0xd3   : > { %v703_v29 = vadd.f32 %v1453_v21, %v702_v28 }
  0xd5   : > { %v714_v31 = vpack.c.bf16 %v703_v29, %v703_v29 }
  0xd7   : > { %v718_v34 = vunpack.c.l.b16 %v714_v31 }
  0xd9   : > { %v1975_v36 = vpack.c.b16 %v718_v34, %v717_v30 }
  0xdb   : > { %769 = vrot.lane.b32.xlu2 %v1975_v36, %s1730_s18  ;;  %v725_v38 = vsel %vm720_vm2, %v1975_v36, 0  ;;  %s1740_s18 = smov 24  }
  0xdc   : > { %734 = vmatpush.bf16.xpose.msra.mxu2 %v725_v38 }
  0xe3   : > { %793 = vrot.lane.b32.xlu2 %v1975_v36, %s1731_s9 }
  0xeb   : > { %935 = vrot.lane.b32.xlu2 %v1975_v36, %s1732_s23 }
 0x135   : > { %v770_v48 = vpop.permute.xlu2 %769 }
 0x136   : > { %782 = vmatpush.bf16.msra.mxu3 %v770_v48 }
 0x13b   : > { %v606_v23 = vpop.xlane.xlu0 %605 }
 0x13c   : > { %v607_v24 = vmul.f32 %v606_v23, %v600_v13 }
 0x13d   : > { %v794_v49 = vpop.permute.xlu2 %793 }
 0x13e   : > { %v608_v26 = vadd.f32 1e-06, %v607_v24  ;;  %v799_v50 = vsel %vm720_vm2, %v794_v49, 0 }
 0x13f   : > { %808 = vmatpush.bf16.xpose.msrb.mxu3 %v799_v50 }
 0x140   : > { %1458 = vrsqrt.f32 %v608_v26  ;;  %vm615_vm4 = vweird.f32 %v608_v26 }
 0x145   : > { %v936_v20 = vpop.permute.xlu2 %935 }
 0x146   : > { %v1459_v32 = vpop.eup %1458  ;;  %v941_v22 = vsel %vm720_vm2, %v936_v20, 0 }
 0x147   : > { %v610_v33 = vmul.f32 %v1459_v32, %v608_v26  ;;  %vm616_vm3 = vweird.f32 %v1459_v32 }
 0x148   : > { %vm617_vm5 = vmor %vm615_vm4, %vm616_vm3 }
 0x149   : > { %v611_v35 = vmul.f32 %v1459_v32, %v610_v33 }
 0x14b   : > { %v612_v37 = vmul.f32 0.5, %v611_v35 }
 0x14d   : > { %v613_v39 = vsub.f32 1.5, %v612_v37 }
 0x14f   : > { %v614_v40 = vmul.f32 %v1459_v32, %v613_v39 }
 0x151   : > { %v618_v42 = vsel %vm617_vm5, %v1459_v32, %v614_v40 }
 0x152   : > { %v619_v43 = vmul.f32 %v618_v42, %v602_v16 }
 0x154   : > { %v623_v45 = vmul.f32 %v1451_v41, %v619_v43 }
 0x156   : > { %v627_v46 = vadd.f32 %v1452_v44, %v623_v45 }
 0x158   : > { %v628_v47 = vpack.c.bf16 %v627_v46, %v627_v46 }
 0x15a   : > { %1293 = vmatmul.msk.bf16.vlgmr.msra.gmra.mxu0 %vm590_vm0, %v628_v47 }
 0x1d7   : > { %v664_v52 = vpop.f32.mrf.mxu0 }
 0x1d8   : > { %v665_v53 = vadd.f32 %v1454_v51, %v664_v52 }
 0x1da   : > { %v712_v54 = vpack.c.bf16 %v665_v53, %v665_v53 }
 0x1dc   : > { %v789_v55 = vunpack.c.l.b16 %v712_v54  ;;  %1303 = vmatmul.msk.bf16.vlgmr.msra.gmra.mxu2 %vm720_vm2, %v712_v54 }
 0x1de   : > { %v790_v56 = vpack.c.b16 %v789_v55, %v789_v55 }
 0x1df   : > { %v666_v57 = vpop.f32.mrf.mxu0 }
 0x1e0   : > { %862 = vrot.lane.b32.xlu2 %v790_v56, %s1733_s12  ;;  %791 = vrot.lane.b32.xlu0 %v790_v56, %s1731_s9  ;;  %s1079_s9 = scalar_lea.hbm %s2135_s11, %s1335_s17 }
 0x1e1   : > { %s1082_s30 = sshll.u32 %s1079_s9, 4  ;;  %s1083_s30 = int_to_ptr.hbm [resolvable:$true] %s1082_s30 }
 0x1e8   : > { %933 = vrot.lane.b32.xlu2 %v790_v56, %s1732_s23  ;;  %s1080_s23 = sshll.u32 %s2002_s5, 4  ;;  %s1081_s23 = int_to_ptr.vmem [resolvable:$true] %s1080_s23 }
 0x23a   : > { %v863_v25 = vpop.permute.xlu2 %862 }
 0x242   : > { %v934_v27 = vpop.permute.xlu2 %933 }
 0x252   : > { %v792_v26 = vpop.permute.xlu0 %791 }
 0x25f   : > { %v736_v59 = vpop.f32.mrf.mxu2 }
 0x260   : > { %v740_v62 = vmul.f32 0.35355338, %v736_v59 }
 0x262   : > { %v741_v63 = vadd.f32 %v740_v62, %v1995_v61 }
 0x264   : > { %v743_v1 = vsel %vm742_vm7, %v741_v63, -inf }
 0x265   : > { %744 = vmax.xlane.f32.xlu1 %v743_v1 }
 0x267   : > { %v738_v2 = vpop.f32.mrf.mxu2 }
 0x2d8   : > { %v745_v3 = vpop.xlane.xlu1 %744 }
 0x2d9   : > { %v746_v4 = vsub.f32 %v741_v63, %v745_v3 }
 0x2db   : > { %v747_v5 = vmul.f32 1.442695, %v746_v4 }
 0x2dd   : > { %1460 = vpow2.f32 %v747_v5 }
 0x2e3   : > { %v1461_v6 = vpop.eup %1460 }
 0x2e4   : > { %v749_v7 = vsel %vm742_vm7, %v1461_v6, 0.0 }
 0x2e5   : > { %750 = vadd.xlane.f32.xlu1 %v749_v7 }
 0x2fe   : > { %864 = vrot.lane.b32.xlu1 %v1975_v36, %s1733_s12  ;;  %s1640_s12 = sshra.s32 %s1083_s30, 4  ;;  %s1641_s12 = int_to_ptr.hbm [resolvable:$true] %s1640_s12 }
 0x2ff   : > { %s1642_s16 = scalar_lea.hbm %s1641_s12, 32  ;;  %p1647_p12 = scmp.lt.s32.totalorder %s1641_s12, %s2135_s11 }
 0x300   : > { %p1643_p1 = scmp.ne.s32.totalorder %s1641_s12, %s1642_s16  ;;  %p1648_p13 = scmp.lt.s32.totalorder %s1646_s24, %s1642_s16 }
 0x302   : > { %p1644_p4 = pnand %p1643_p1, %p1898_p5  ;;  %p1649_p0 = por %p1648_p13, %p1647_p12 }
 0x304   : > { %p1645_p10 = pneg %p1644_p4 }
 0x306   : > { %p1650_p3 = pnand %p1649_p0, %p1645_p10 }
 0x358   : > { %v751_v8 = vpop.xlane.xlu1 %750 }
 0x359   : > { %1462 = vrcp.f32 %v751_v8  ;;  %v763_v12 = vand.u32 2147483648, %v751_v8  ;;  %v761_v14 = vand.u32 2147483647, %v751_v8  ;;  %vm757_vm9 = vweird.f32 %v751_v8 }
 0x35b   : > { %v764_v16 = vor.u32 1.1754944e-38, %v763_v12  ;;  %vm762_vm11 = vcmp.eq.f32.partialorder %v761_v14, 8.507059e+37 }
 0x35f   : > { %v1463_v9 = vpop.eup %1462 }
 0x360   : > { %v753_v10 = vmul.f32 %v1463_v9, %v751_v8  ;;  %vm758_vm8 = vweird.f32 %v1463_v9 }
 0x361   : > { %vm759_vm10 = vmor %vm757_vm9, %vm758_vm8 }
 0x362   : > { %v754_v11 = vsub.f32 1.0, %v753_v10 }
 0x364   : > { %v755_v13 = vmul.f32 %v1463_v9, %v754_v11 }
 0x366   : > { %v756_v15 = vadd.f32 %v1463_v9, %v755_v13 }
 0x368   : > { %v760_v17 = vsel %vm759_vm10, %v1463_v9, %v756_v15 }
 0x369   : > { %v765_v18 = vsel %vm762_vm11, %v764_v16, %v760_v17  ;;  %vm1018_vm11 = vcmask 195584  }
 0x36a   : > { %v766_v19 = vmul.f32 %v1461_v6, %v765_v18 }
 0x36c   : > { %767 = vst.msk [vmem:[%s2002_s5] sm:$0xff] %vm742_vm7, %v766_v19  ;;  %v768_v21 = vpack.c.bf16 %v766_v19, %v766_v19 }
 0x36e   : > { %1304 = vmatmul.msk.bf16.vlgmr.msra.gmra.mxu3 %vm742_vm7, %v768_v21 }
 0x36f   : > { %950 = vmatpush.bf16.xpose.msra.mxu3 %v941_v22 }
 0x370   : > { %v865_v23 = vpop.permute.xlu1 %864 }
 0x371   : > { %v870_v24 = vsel %vm720_vm2, %v865_v23, 0 }
 0x372   : > { %879 = vmatpush.bf16.xpose.msrb.mxu1 %v870_v24 }
 0x379   : > { %1308 = vmatmul.msk.bf16.vlgmr.msrb.gmra.mxu1 %vm720_vm2, %v863_v25 }
 0x37e   : > { %1305 = vmatmul.msk.bf16.vlgmr.msrb.gmra.mxu3 %vm720_vm2, %v792_v26 }
 0x38e   : > { %1311 = vmatmul.msk.bf16.vlgmr.msra.gmra.mxu3 %vm720_vm2, %v934_v27 }
 0x3f1   : > { %v2012_v28 = vpop.f32.mrf.mxu3 }
 0x3f6   : > { %v881_v29 = vpop.f32.mrf.mxu1 }
 0x3f7   : > { %v885_v30 = vmul.f32 0.35355338, %v881_v29 }
 0x3f9   : > { %v786_v31 = vpop.f32.mrf.mxu3  ;;  %v886_v32 = vadd.f32 %v885_v30, %v1995_v61 }
 0x3fb   : > { %v887_v33 = vsel %vm742_vm7, %v886_v32, -inf }
 0x3fc   : > { %888 = vmax.xlane.f32.xlu2 %v887_v33 }
 0x3fe   : > { %v883_v34 = vpop.f32.mrf.mxu1 }
 0x401   : > { %v810_v35 = vpop.f32.mrf.mxu3 }
 0x402   : > { %v814_v37 = vmul.f32 0.35355338, %v810_v35 }
 0x404   : > { %v815_v38 = vadd.f32 %v814_v37, %v1995_v61 }
 0x406   : > { %v816_v39 = vsel %vm742_vm7, %v815_v38, -inf }
 0x407   : > { %817 = vmax.xlane.f32.xlu0 %v816_v39 }
 0x409   : > { %v812_v40 = vpop.f32.mrf.mxu3 }
 0x411   : > { %v952_v41 = vpop.f32.mrf.mxu3 }
 0x412   : > { %v956_v42 = vmul.f32 0.35355338, %v952_v41 }
 0x414   : > { %v957_v43 = vadd.f32 %v956_v42, %v1995_v61 }
 0x416   : > { %v958_v44 = vsel %vm742_vm7, %v957_v43, -inf }
 0x417   : > { %959 = vmax.xlane.f32.xlu1 %v958_v44 }
 0x419   : > { %v954_v45 = vpop.f32.mrf.mxu3 }
 0x46f   : > { %v889_v46 = vpop.xlane.xlu2 %888 }
 0x470   : > { %v890_v47 = vsub.f32 %v886_v32, %v889_v46 }
 0x472   : > { %v891_v48 = vmul.f32 1.442695, %v890_v47  ;;  %v1334_v47 = vld [vmem:[#allocation10 + $0x8] sm:$0xff] }
 0x473   : > { %1042 = vmatpush.bf16.msra.mxu1 %v1334_v47 }
 0x474   : > { %1464 = vpow2.f32 %v891_v48  ;;  %v1333_v48 = vld [vmem:[#allocation10] sm:$0xff] }
 0x477   : > { %1043 = vmatpush.bf16.msra.mxu1 %v1333_v48 }
 0x47a   : > { %v1465_v49 = vpop.eup %1464  ;;  %v818_v50 = vpop.xlane.xlu0 %817 }
 0x47b   : > { %v819_v51 = vsub.f32 %v815_v38, %v818_v50  ;;  %v893_v52 = vsel %vm742_vm7, %v1465_v49, 0.0 }
 0x47c   : > { %894 = vadd.xlane.f32.xlu2 %v893_v52 }
 0x47d   : > { %v820_v53 = vmul.f32 1.442695, %v819_v51 }
 0x47f   : > { %1466 = vpow2.f32 %v820_v53 }
 0x485   : > { %v1467_v54 = vpop.eup %1466 }
 0x486   : > { %v822_v55 = vsel %vm742_vm7, %v1467_v54, 0.0 }
 0x487   : > { %823 = vadd.xlane.f32.xlu0 %v822_v55 }
 0x48a   : > { %v960_v56 = vpop.xlane.xlu1 %959 }
 0x48b   : > { %v961_v57 = vsub.f32 %v957_v43, %v960_v56 }
 0x48d   : > { %v962_v58 = vmul.f32 1.442695, %v961_v57 }
 0x48f   : > { %1468 = vpow2.f32 %v962_v58 }
 0x494   : > { %914 = vrot.lane.b32.xlu2 %v1975_v36, %s1735_s10 }
 0x495   : > { %v2023_v59 = vpop.eup %1468 }
 0x496   : > { %v964_v60 = vsel %vm742_vm7, %v2023_v59, 0.0 }
 0x497   : > { %965 = vadd.xlane.f32.xlu1 %v964_v60 }
 0x49b   : > { %843 = vrot.lane.b32.xlu0 %v1975_v36, %s1736_s15 }
 0x4b0   : > { %985 = vrot.lane.b32.xlu1 %v1975_v36, %s1737_s14 }
 0x4ef   : > { %v895_v61 = vpop.xlane.xlu2 %894 }
 0x4f0   : > { %1470 = vrcp.f32 %v895_v61  ;;  %v907_v3 = vand.u32 2147483648, %v895_v61  ;;  %v905_v6 = vand.u32 2147483647, %v895_v61  ;;  %vm901_vm13 = vweird.f32 %v895_v61 }
 0x4f2   : > { %v908_v8 = vor.u32 1.1754944e-38, %v907_v3  ;;  %vm906_vm15 = vcmp.eq.f32.partialorder %v905_v6, 8.507059e+37 }
 0x4f6   : > { %v1471_v62 = vpop.eup %1470 }
 0x4f7   : > { %v897_v63 = vmul.f32 %v1471_v62, %v895_v61  ;;  %v915_v1 = vpop.permute.xlu2 %914  ;;  %vm902_vm12 = vweird.f32 %v1471_v62 }
 0x4f8   : > { %927 = vmatpush.bf16.msrb.mxu2 %v915_v1  ;;  %vm903_vm14 = vmor %vm901_vm13, %vm902_vm12 }
 0x4f9   : > { %v898_v2 = vsub.f32 1.0, %v897_v63 }
 0x4fa   : > { %v824_v4 = vpop.xlane.xlu0 %823 }
 0x4fb   : > { %v899_v5 = vmul.f32 %v1471_v62, %v898_v2  ;;  %1472 = vrcp.f32 %v824_v4  ;;  %v836_v16 = vand.u32 2147483648, %v824_v4  ;;  %v834_v17 = vand.u32 2147483647, %v824_v4 }
 0x4fc   : > { %vm830_vm3 = vweird.f32 %v824_v4 }
 0x4fd   : > { %v900_v7 = vadd.f32 %v1471_v62, %v899_v5  ;;  %v837_v20 = vor.u32 1.1754944e-38, %v836_v16  ;;  %vm835_vm5 = vcmp.eq.f32.partialorder %v834_v17, 8.507059e+37 }
 0x4ff   : > { %v904_v9 = vsel %vm903_vm14, %v1471_v62, %v900_v7 }
 0x500   : > { %v909_v36 = vsel %vm906_vm15, %v908_v8, %v904_v9 }
 0x501   : > { %v1473_v10 = vpop.eup %1472  ;;  %v910_v11 = vmul.f32 %v1465_v49, %v909_v36 }
 0x502   : > { %v826_v12 = vmul.f32 %v1473_v10, %v824_v4  ;;  %vm831_vm1 = vweird.f32 %v1473_v10 }
 0x503   : > { %1309 = vst.msk [vmem:[%s2002_s5 + $0x10] sm:$0xff] %vm742_vm7, %v910_v11  ;;  %v913_v13 = vpack.c.bf16 %v910_v11, %v910_v11  ;;  %vm832_vm4 = vmor %vm830_vm3, %vm831_vm1 }
 0x504   : > { %v827_v14 = vsub.f32 1.0, %v826_v12 }
 0x505   : > { %1310 = vmatmul.msk.bf16.vlgmr.msrb.gmra.mxu2 %vm742_vm7, %v913_v13 }
 0x506   : > { %v828_v15 = vmul.f32 %v1473_v10, %v827_v14 }
 0x508   : > { %v829_v18 = vadd.f32 %v1473_v10, %v828_v15 }
 0x50a   : > { %v833_v19 = vsel %vm832_vm4, %v1473_v10, %v829_v18  ;;  %v966_v21 = vpop.xlane.xlu1 %965 }
 0x50b   : > { %1474 = vrcp.f32 %v966_v21  ;;  %v838_v22 = vsel %vm835_vm5, %v837_v20, %v833_v19  ;;  %v978_v30 = vand.u32 2147483648, %v966_v21  ;;  %v976_v32 = vand.u32 2147483647, %v966_v21 }
 0x50c   : > { %v839_v24 = vmul.f32 %v1467_v54, %v838_v22  ;;  %vm972_vm8 = vweird.f32 %v966_v21 }
 0x50d   : > { %v844_v23 = vpop.permute.xlu0 %843  ;;  %v979_v34 = vor.u32 1.1754944e-38, %v978_v30  ;;  %vm977_vm10 = vcmp.eq.f32.partialorder %v976_v32, 8.507059e+37 }
 0x50e   : > { %856 = vmatpush.bf16.msrb.mxu0 %v844_v23  ;;  %1306 = vst.msk [vmem:[%s2002_s5 + $0x8] sm:$0xff] %vm742_vm7, %v839_v24  ;;  %v842_v25 = vpack.c.bf16 %v839_v24, %v839_v24 }
 0x511   : > { %v1475_v26 = vpop.eup %1474  ;;  %1307 = vmatmul.msk.bf16.vlgmr.msrb.gmra.mxu0 %vm742_vm7, %v842_v25 }
 0x512   : > { %v968_v27 = vmul.f32 %v1475_v26, %v966_v21  ;;  %vm973_vm6 = vweird.f32 %v1475_v26 }
 0x513   : > { %vm974_vm9 = vmor %vm972_vm8, %vm973_vm6 }
 0x514   : > { %v969_v29 = vsub.f32 1.0, %v968_v27 }
 0x516   : > { %v970_v31 = vmul.f32 %v1475_v26, %v969_v29 }
 0x518   : > { %v971_v33 = vadd.f32 %v1475_v26, %v970_v31 }
 0x51a   : > { %v975_v35 = vsel %vm974_vm9, %v1475_v26, %v971_v33 }
 0x51b   : > { %v980_v37 = vsel %vm977_vm10, %v979_v34, %v975_v35 }
 0x51c   : > { %v981_v38 = vmul.f32 %v2023_v59, %v980_v37 }
 0x51e   : > { %1312 = vst.msk [vmem:[%s2002_s5 + $0x18] sm:$0xff] %vm742_vm7, %v981_v38  ;;  %v984_v40 = vpack.c.bf16 %v981_v38, %v981_v38 }
 0x522   : > { %v986_v39 = vpop.permute.xlu1 %985 }
 0x523   : > { %998 = vmatpush.bf16.msra.mxu0 %v986_v39 }
 0x526   : > { %1313 = vmatmul.msk.bf16.vlgmr.msra.gmra.mxu0 %vm742_vm7, %v984_v40 }
 0x588   : > { %v929_v41 = vpop.f32.mrf.mxu2 }
 0x589   : > { %1009 = vrot.lane.b32.xlu2 %v929_v41, %s1738_s27 }
 0x58e   : > { %v858_v42 = vpop.f32.mrf.mxu0 }
 0x58f   : > { %1005 = vrot.lane.b32.xlu0 %v858_v42, %s1739_s13 }
 0x590   : > { %v931_v43 = vpop.f32.mrf.mxu2 }
 0x596   : > { %v860_v44 = vpop.f32.mrf.mxu0 }
 0x5a3   : > { %v1000_v45 = vpop.f32.mrf.mxu0 }
 0x5a4   : > { %1013 = vrot.lane.b32.xlu0 %v1000_v45, %s1740_s18 }
 0x5ab   : > { %v1002_v46 = vpop.f32.mrf.mxu0 }
 0x5e3   : > { %v1010_v51 = vpop.permute.xlu2 %1009 }
 0x601   : > { %v1006_v49 = vpop.permute.xlu0 %1005 }
 0x602   : > { %v1016_v50 = vsel %vm720_vm2, %v2012_v28, %v1006_v49 }
 0x603   : > { %v1017_v53 = vsel %vm742_vm7, %v1016_v50, %v1010_v51 }
 0x616   : > { %v1014_v52 = vpop.permute.xlu0 %1013 }
 0x617   : > { %v1019_v54 = vsel %vm1018_vm11, %v1017_v53, %v1014_v52 }
 0x618   : > { %v1020_v55 = vpack.c.bf16 %v1019_v54, %v1019_v54 }
 0x61a   : > { %1322 = vmatmul.msk.bf16.vlgmr.msra.gmra.mxu1 %vm590_vm0, %v1020_v55 }
 0x61b   : > { %1653 = shalt.err (!%p1650_p3)
}
 0x61c   : > { %s1741_s7 = smov 128   ;;  %s2136_s17 = sld [smem:[#allocation26_spill]] }
 0x61d   : > { %1352 = dma.vmem_to_hbm [thread:$0]  (%p1898_p5), %s1081_s23, 512, %s1083_s30, %s1064_s1, %s1741_s7, %s1741_s7, %s1739_s13  }
 0x61e   : > { %s2137_s9 = sld [smem:[#allocation27_spill]] }
 0x622   : > { %v1455_v28 = vld [vmem:[%s2136_s17] ss:$0 sm:$0xff] }
 0x624   : > { %s585_s12 = scalar_lea.vmem %s2137_s9, %s1283_s29 }
 0x697   : > { %v1045_v56 = vpop.f32.mrf.mxu1 }
 0x698   : > { %v1049_v57 = vadd.f32 %v1045_v56, %v1965_v0 }
 0x69a   : > { %v1054_v58 = vadd.f32 %v1455_v28, %v1049_v57 }
 0x69c   : > { %1055 = vst.msk [vmem:[%s585_s12] sm:$0xff] %vm590_vm0, %v1054_v58 }
 0x69f   : > { %v1047_v59 = vpop.f32.mrf.mxu1 }
 0x6a0 PF: > { %s2138_s21 = sld [smem:[#allocation17_spill]]  ;;  %p1372_p5 = pnand %p1270_p11, %p1852_p6 }
 0x6a2   : > { %p1373_p7 = pneg %p1372_p5 }
 0x6a6   : > { %s1107_s13 = sand.u32 1, %s2138_s21  }
 0x6a7   : > { %s1108_s23 = scalar_lea.sflag [#allocation4], %s1107_s13 }
 0x6a8   : > { %1695 = dma.done.wait (%p1373_p7), %s1108_s23, 512  }
 0x6a9   : > { %1697 = vsyncadd (%p1373_p7), %s1108_s23, 4294966784  ;;  %s33_s26 = sadd.s32 1, %s1720_s26   ;;  %s2140_s19 = sld [smem:[#allocation18_spill]] }
 0x6aa   : > { %p30_p9 = scmp.ge.s32.totalorder %s33_s26, 4   ;;  %s2141_s23 = sld [smem:[#allocation21_spill]] }
 0x6ab   : > { %s2142_s29 = sld [smem:[#allocation20_spill]]  ;;  %s2143_s21 = smov %s1704_s22 }
 0x6ac   : > { %s2145_s24 = smov %s1716_s25 }
 0x6ad   :  { %32 = sbr.rel (!%p30_p9) target bundleno = 17 (0x11), region = 152 }
 0x6af   : > { %s2144_s22 = smov %s2140_s19 }
 0x6b1   : > { %s2146_s25 = smov %s2142_s29 }
 0x6b2   :  { %1114 = vsyncpa [#allocation3], 1 }
 0x6b3   :  { %1116 = vsyncpa [#allocation3 + $0x1], 1 }
 0x6b4   :  { %1117 = vsyncpa [#allocation6], 1 }
 0x6b5   :  { %1119 = vsyncpa [#allocation6 + $0x1], 1 }
 0x6b6   :  { %1120 = vsyncpa [#allocation9], 1 }
 0x6b7   :  { %1121 = vsyncpa [#allocation4], 1 }
 0x6b8   :  { %1123 = vsyncpa [#allocation4 + $0x1], 1 }

// kernel: _lambda_.5
= control target key start
LH: loop header
LB: loop body
LE: loop exit
PB: predicated region body
PF: predicated region fallthrough
CT: control target
= control target key end

     0   :  { %12 = vsyncpa [#allocation3], 0  ;;  %s465_s0 = inlined_call_operand.vmem [shape: f32[16,32], index: 0, kind: input, shape index: {}]   ;;  %s466_s1 = inlined_call_operand.vmem [shape: f32[1,32], index: 1, kind: input, shape index: {}]   ;;  %s467_s2 = inlined_call_operand.vmem [shape: f32[1,32], index: 2, kind: input, shape index: {}, may-alias: {2,6}]   ;;  %s468_s3 = inlined_call_operand.hbm [shape: bf16[32,64], index: 3, kind: input, shape index: {}]   ;;  %s469_s4 = inlined_call_operand.vmem [shape: f32[1,64], index: 4, kind: input, shape index: {}]   ;;  %s470_s5 = inlined_call_operand.hbm [shape: bf16[64,32], index: 5, kind: input, shape index: {}]   ;;  %s471_s6 = inlined_call_operand.vmem [shape: f32[1,32], index: 6, kind: input, shape index: {}, may-alias: {2,6}]   ;;  %s472_s7 = inlined_call_operand.hbm [shape: f32[16,32], index: 7, kind: output, shape index: {}]  }
   0x1   :  { %13 = vsyncpa [#allocation6], 0 }
   0x2   :  { %14 = vsyncpa [#allocation4], 0  ;;  %s25_s26 = sshll.u32 %s468_s3, 4  ;;  %s373_s27 = smov [#allocation2]   ;;  %s26_s26 = int_to_ptr.hbm [resolvable:$true] %s25_s26 }
   0x3   :  { %s27_s28 = sshll.u32 %s373_s27, 4  ;;  %s40_s8 = sshll.u32 %s470_s5, 4  ;;  %s28_s28 = int_to_ptr.vmem [resolvable:$true] %s27_s28  ;;  %s41_s8 = int_to_ptr.hbm [resolvable:$true] %s40_s8 }
   0x4   :  { %s374_s9 = smov 64   ;;  %s375_s10 = smov 4  }
   0x5   :  { %33 = dma.hbm_to_vmem [thread:$0]  %s26_s26, 256, %s28_s28, [#allocation3], %s374_s9, %s374_s9, %s375_s10  }
   0x6   :  { %s376_s11 = smov [#allocation5]  }
   0x7   :  { %s42_s12 = sshll.u32 %s376_s11, 4  ;;  %s43_s12 = int_to_ptr.vmem [resolvable:$true] %s42_s12 }
   0x8   :  { %48 = dma.hbm_to_vmem [thread:$0]  %s41_s8, 512, %s43_s12, [#allocation6], %s374_s9, %s374_s9, %s375_s10  }
   0x9   :  { %367 = dma.done.wait [#allocation3], 256  }
   0xa   :  { %368 = vsyncadd [#allocation3], 4294967040 }
   0xb   :  { %369 = dma.done.wait [#allocation6], 512  }
   0xc   :  { %370 = vsyncadd [#allocation6], 4294966784  ;;  %vm64_vm0 = vcmask 261120   ;;  %v430_v0 = vld [vmem:[%s465_s0] sm:$0xff]  ;;  %v437_v2 = vld [vmem:[%s465_s0 + $0x8] sm:$0xff]  ;;  %v377_v4 = vmov 32.0  }
   0xd   :  { %v65_v1 = vsel %vm64_vm0, %v430_v0, 0.0  ;;  %v68_v3 = vsel %vm64_vm0, %v437_v2, 0.0  ;;  %289 = vrcp.f32 %v377_v4  ;;  %v272_v21 = vld [vmem:[#allocation2 + $0x8] sm:$0xff]  ;;  %v271_v23 = vld [vmem:[#allocation2] sm:$0xff]  ;;  %v274_v54 = vld [vmem:[#allocation5 + $0x8] sm:$0xff]  ;;  %vm203_vm8 = vcmask 523264  }
   0xe   :  { %66 = vadd.xlane.f32.xlu0 %v65_v1  ;;  %156 = vmatpush.bf16.msra.mxu0 %v272_v21  ;;  %v285_v42 = vld [vmem:[%s466_s1] ss:$0 sm:$0xff]  ;;  %v276_v52 = vld [vmem:[#allocation5 + $0x18] sm:$0xff]  ;;  %v273_v55 = vld [vmem:[#allocation5] sm:$0xff]  ;;  %s378_s20 = smov [#allocation7]   ;;  %s231_s23 = sshll.u32 %s472_s7, 4  ;;  %s232_s23 = int_to_ptr.hbm [resolvable:$true] %s231_s23 }
   0xf   :  { %v286_v47 = vld [vmem:[%s467_s2] ss:$0 sm:$0xff]  ;;  %211 = vmatpush.bf16.msra.mxu1 %v276_v52  ;;  %s380_s24 = smov 8  }
  0x10   :  { %v275_v53 = vld [vmem:[#allocation5 + $0x10] sm:$0xff] }
  0x11   :  { %v287_v57 = vld [vmem:[%s469_s4] ss:$0 sm:$0xff]  ;;  %s229_s4 = sshll.u32 %s378_s20, 4  ;;  %s230_s4 = int_to_ptr.vmem [resolvable:$true] %s229_s4 }
  0x12   :  { %157 = vmatpush.bf16.msra.mxu0 %v271_v23  ;;  %v288_v1 = vld [vmem:[%s471_s6] ss:$0 sm:$0xff]  ;;  %s379_s6 = smov 128  }
  0x13   :  { %v290_v5 = vpop.eup %289  ;;  %212 = vmatpush.bf16.msra.mxu1 %v275_v53 }
  0x14   :  { %v72_v6 = vmul.f32 32.0, %v290_v5  ;;  %vm76_vm1 = vweird.f32 %v290_v5 }
  0x16   :  { %69 = vadd.xlane.f32.xlu0 %v68_v3  ;;  %v73_v7 = vsub.f32 1.0, %v72_v6 }
  0x17   :  { %213 = vmatpush.bf16.msra.mxu1 %v274_v54 }
  0x18   :  { %v74_v8 = vmul.f32 %v290_v5, %v73_v7 }
  0x1a   :  { %v75_v9 = vadd.f32 %v290_v5, %v74_v8 }
  0x1b   :  { %214 = vmatpush.bf16.msra.mxu1 %v273_v55 }
  0x1c   :  { %v77_v10 = vsel %vm76_vm1, %v290_v5, %v75_v9 }
  0x81   :  { %v67_v11 = vpop.xlane.xlu0 %66 }
  0x82   :  { %v78_v12 = vmul.f32 %v77_v10, %v67_v11 }
  0x84   :  { %v80_v13 = vsub.f32 %v430_v0, %v78_v12 }
  0x86   :  { %v82_v14 = vmul.f32 %v80_v13, %v80_v13 }
  0x88   :  { %v84_v15 = vsel %vm64_vm0, %v82_v14, 0.0 }
  0x89   :  { %85 = vadd.xlane.f32.xlu1 %v84_v15  ;;  %v70_v16 = vpop.xlane.xlu0 %69 }
  0x8a   :  { %v79_v17 = vmul.f32 %v77_v10, %v70_v16 }
  0x8c   :  { %v81_v18 = vsub.f32 %v437_v2, %v79_v17 }
  0x8e   :  { %v83_v19 = vmul.f32 %v81_v18, %v81_v18 }
  0x90   :  { %v87_v20 = vsel %vm64_vm0, %v83_v19, 0.0 }
  0x91   :  { %88 = vadd.xlane.f32.xlu1 %v87_v20 }
  0xfc   :  { %v86_v22 = vpop.xlane.xlu1 %85 }
  0xfd   :  { %v90_v24 = vmul.f32 %v86_v22, %v77_v10 }
  0xff   :  { %v92_v25 = vadd.f32 1e-06, %v90_v24 }
 0x101   :  { %291 = vrsqrt.f32 %v92_v25  ;;  %vm100_vm3 = vweird.f32 %v92_v25 }
 0x104   :  { %v89_v26 = vpop.xlane.xlu1 %88 }
 0x105   :  { %v91_v27 = vmul.f32 %v89_v26, %v77_v10 }
 0x107   :  { %v292_v28 = vpop.eup %291  ;;  %v93_v29 = vadd.f32 1e-06, %v91_v27 }
 0x108   :  { %v95_v30 = vmul.f32 %v292_v28, %v92_v25  ;;  %vm101_vm2 = vweird.f32 %v292_v28 }
 0x109   :  { %293 = vrsqrt.f32 %v93_v29  ;;  %vm102_vm4 = vmor %vm100_vm3, %vm101_vm2  ;;  %vm110_vm6 = vweird.f32 %v93_v29 }
 0x10a   :  { %v96_v31 = vmul.f32 %v292_v28, %v95_v30 }
 0x10c   :  { %v97_v32 = vmul.f32 0.5, %v96_v31 }
 0x10e   :  { %v98_v33 = vsub.f32 1.5, %v97_v32 }
 0x10f   :  { %v294_v34 = vpop.eup %293 }
 0x110   :  { %v99_v35 = vmul.f32 %v292_v28, %v98_v33  ;;  %v105_v36 = vmul.f32 %v294_v34, %v93_v29  ;;  %vm111_vm5 = vweird.f32 %v294_v34 }
 0x111   :  { %vm112_vm7 = vmor %vm110_vm6, %vm111_vm5 }
 0x112   :  { %v106_v37 = vmul.f32 %v294_v34, %v105_v36  ;;  %v103_v38 = vsel %vm102_vm4, %v292_v28, %v99_v35 }
 0x113   :  { %v114_v41 = vmul.f32 %v103_v38, %v80_v13 }
 0x114   :  { %v107_v39 = vmul.f32 0.5, %v106_v37 }
 0x115   :  { %v119_v46 = vmul.f32 %v285_v42, %v114_v41 }
 0x116   :  { %v108_v40 = vsub.f32 1.5, %v107_v39 }
 0x117   :  { %v124_v49 = vadd.f32 %v286_v47, %v119_v46 }
 0x118   :  { %v109_v43 = vmul.f32 %v294_v34, %v108_v40 }
 0x11a   :  { %v113_v44 = vsel %vm112_vm7, %v294_v34, %v109_v43 }
 0x11b   :  { %v115_v45 = vmul.f32 %v113_v44, %v81_v18 }
 0x11d   :  { %v120_v48 = vmul.f32 %v285_v42, %v115_v45 }
 0x11f   :  { %v125_v50 = vadd.f32 %v286_v47, %v120_v48 }
 0x121   :  { %v126_v51 = vpack.c.bf16 %v125_v50, %v124_v49 }
 0x123   :  { %253 = vmatmul.msk.bf16.vlgmr.msra.gmra.mxu0 %vm64_vm0, %v126_v51 }
 0x1a0   :  { %v159_v56 = vpop.f32.mrf.mxu0 }
 0x1a1   :  { %v160_v58 = vadd.f32 %v287_v57, %v159_v56 }
 0x1a3   :  { %v164_v61 = vmax.f32 %v160_v58, 0.0 }
 0x1a8   :  { %v161_v59 = vpop.f32.mrf.mxu0 }
 0x1a9   :  { %v162_v60 = vadd.f32 %v287_v57, %v161_v59 }
 0x1ab   :  { %v165_v62 = vmax.f32 %v162_v60, 0.0 }
 0x1ad   :  { %v166_v63 = vpack.c.bf16 %v165_v62, %v164_v61 }
 0x1af   :  { %270 = vmatmul.msk.bf16.vlgmr.msra.gmra.mxu1 %vm203_vm8, %v166_v63 }
 0x22c   :  { %v216_v3 = vpop.f32.mrf.mxu1 }
 0x22d   :  { %v217_v4 = vadd.f32 %v288_v1, %v216_v3 }
 0x22f   :  { %v221_v5 = vadd.f32 %v217_v4, %v430_v0 }
 0x231   :  { %223 = vst.msk [vmem:[#allocation7] sm:$0xff] %vm64_vm0, %v221_v5 }
 0x234   :  { %v218_v6 = vpop.f32.mrf.mxu1 }
 0x235   :  { %v219_v7 = vadd.f32 %v288_v1, %v218_v6 }
 0x237   :  { %v222_v8 = vadd.f32 %v219_v7, %v437_v2 }
 0x239   :  { %224 = vst.msk [vmem:[#allocation7 + $0x8] sm:$0xff] %vm64_vm0, %v222_v8 }
 0x23a   :  { %237 = dma.vmem_to_hbm [thread:$0]  %s230_s4, 256, %s232_s23, [#allocation4], %s379_s6, %s379_s6, %s380_s24  }
 0x23b   :  { %371 = dma.done.wait [#allocation4], 256  }
 0x23c   :  { %372 = vsyncadd [#allocation4], 4294967040 }
 0x23d   :  { %242 = vsyncpa [#allocation3], 1 }
 0x23e   :  { %243 = vsyncpa [#allocation6], 1 }
 0x23f   :  { %244 = vsyncpa [#allocation4], 1 }

// kernel: _lambda_.3
= control target key start
LH: loop header
LB: loop body
LE: loop exit
PB: predicated region body
PF: predicated region fallthrough
CT: control target
= control target key end

     0   :  { %s1894_s0 = inlined_call_operand.hbm [shape: f32[2,8,32], index: 0, kind: input, shape index: {}, may-alias: {0,1}]   ;;  %s1895_s1 = inlined_call_operand.hbm [shape: f32[2,8,32], index: 1, kind: input, shape index: {}, may-alias: {0,1}]   ;;  %s1896_s2 = inlined_call_operand.hbm [shape: s32[2,1,8,8], index: 2, kind: input, shape index: {}]   ;;  %s1897_s3 = inlined_call_operand.vmem [shape: f32[1,32], index: 3, kind: input, shape index: {}]   ;;  %s1898_s4 = inlined_call_operand.vmem [shape: f32[1,32], index: 4, kind: input, shape index: {}, may-alias: {4,6,10}]   ;;  %s1899_s5 = inlined_call_operand.hbm [shape: bf16[32,32], index: 5, kind: input, shape index: {}]   ;;  %s1900_s6 = inlined_call_operand.vmem [shape: f32[1,32], index: 6, kind: input, shape index: {}, may-alias: {4,6,10}]   ;;  %s1901_s7 = inlined_call_operand.vmem [shape: bf16[32,64], index: 7, kind: input, shape index: {}]   ;;  %s1902_s8 = inlined_call_operand.vmem [shape: f32[1,64], index: 8, kind: input, shape index: {}]   ;;  %s1903_s9 = inlined_call_operand.hbm [shape: bf16[32,32], index: 9, kind: input, shape index: {}]   ;;  %s1904_s10 = inlined_call_operand.vmem [shape: f32[1,32], index: 10, kind: input, shape index: {}, may-alias: {4,6,10}]   ;;  %s1905_s11 = inlined_call_operand.vmem [shape: f32[2,8,32], index: 11, kind: output, shape index: {}]  }
   0x1   :  { %1913 = sst [smem:[#allocation18_spill]] %s1895_s1 }
   0x2   :  { %1914 = sst [smem:[#allocation19_spill]] %s1898_s4 }
   0x3   :  { %1915 = sst [smem:[#allocation20_spill]] %s1899_s5 }
   0x4   :  { %1916 = sst [smem:[#allocation21_spill]] %s1900_s6 }
   0x5   :  { %1917 = sst [smem:[#allocation22_spill]] %s1902_s8 }
   0x6   :  { %1918 = sst [smem:[#allocation23_spill]] %s1903_s9 }
   0x7   :  { %1919 = sst [smem:[#allocation24_spill]] %s1904_s10 }
   0x8   :  { %1920 = sst [smem:[#allocation25_spill]] %s1905_s11 }
   0x9   :  { %16 = vsyncpa [#allocation3], 0 }
   0xa   :  { %18 = vsyncpa [#allocation3 + $0x1], 0 }
   0xb   :  { %19 = vsyncpa [#allocation5], 0 }
   0xc   :  { %21 = vsyncpa [#allocation5 + $0x1], 0 }
   0xd   :  { %22 = vsyncpa [#allocation8], 0  ;;  %s1651_s17 = smov 0   ;;  %s1653_s18 = smov 0  }
   0xe   :  { %s1655_s19 = smov 0   ;;  %s1657_s20 = smov 0  }
   0xf   :  { %s1659_s21 = smov 0   ;;  %s1661_s22 = smov 0  }
  0x10 LB: > { %1921 = sst [smem:[#allocation13_spill]] %s1561_s19  ;;  %s1906_s23 = sadd.s32 4294967295, %s1573_s22   ;;  %s1573_s22 = sphi %s1661_s22, %s28_s22   ;;  %s1569_s21 = sphi %s1659_s21, %s1946_s21   ;;  %s1565_s20 = sphi %s1657_s20, %s1945_s20   ;;  %s1561_s19 = sphi %s1655_s19, %s1944_s19   ;;  %s1557_s18 = sphi %s1653_s18, %s1948_s18   ;;  %s1553_s17 = sphi %s1651_s17, %s1947_s17  }
  0x11   : > { %1922 = sst [smem:[#allocation14_spill]] %s1565_s20  ;;  %p1178_p0 = scmp.ge.s32.totalorder %s1573_s22, 1 }
  0x12   : > { %1923 = sst [smem:[#allocation15_spill]] %s1569_s21  ;;  %p1685_p1 = scmp.eq.s32.totalorder %s1906_s23, 0 }
  0x13   : > { %p323_p2 = scmp.lt.s32.totalorder %s1573_s22, 3  ;;  %s1925_s5 = sld [smem:[#allocation20_spill]] }
  0x14   : > { %s1575_s29 = smov [#allocation7]   ;;  %s1907_s13 = smov 64  }
  0x15   : > { %p1693_p3 = pnand %p1178_p0, %p323_p2  ;;  %s342_s30 = sshll.u32 %s1575_s29, 4  ;;  %s343_s30 = int_to_ptr.vmem [resolvable:$true] %s342_s30 }
  0x16   : > { %s1908_s14 = smov 4   ;;  %s40_s15 = sadd.s32 1, %s1569_s21 }
  0x17   : > { %p1252_p4 = pneg %p1693_p3  ;;  %p42_p6 = scmp.ge.s32.totalorder %s40_s15, 2 }
  0x18   : > { %s49_s16 = sadd.s32 1, %s1561_s19  ;;  %p56_p7 = scmp.ne.s32.totalorder %s1561_s19, %s1557_s18 }
  0x19   : > { %s340_s27 = sshll.u32 %s1925_s5, 4  ;;  %p1701_p5 = pnand %p1252_p4, %p1685_p1  ;;  %s341_s27 = int_to_ptr.hbm [resolvable:$true] %s340_s27 }
  0x1a   : > { %p57_p8 = scmp.eq.s32.totalorder %s1573_s22, 0  ;;  %s1950_s15 = smov (%p42_p6, %s40_s15), 0 }
  0x1b   : > { %1255 = dma.hbm_to_vmem [thread:$0]  (!%p1701_p5), %s341_s27, 256, %s343_s30, [#allocation8], %s1907_s13, %s1907_s13, %s1908_s14  }
  0x1c   : > { %1928 = sst [smem:[#allocation16_spill]] %s1950_s15  ;;  %p58_p9 = por %p57_p8, %p56_p7 }
  0x1d   : > { %p62_p10 = scmp.ne.s32.totalorder %s1557_s18, %s1553_s17  ;;  %s44_s25 = ssub.s32 %s1569_s21, %s1950_s15 }
  0x1e   : > { %p1271_p11 = scmp.lt.s32.totalorder %s1573_s22, 2  ;;  %p47_p12 = scmp.eq.s32.totalorder %s44_s25, 0 }
  0x1f   : > { %p1724_p13 = por %p1685_p1, %p62_p10  ;;  %s382_s27 = sand.u32 1, %s1561_s19  }
  0x20   : > { %s1730_s29 = sshll.u32 %s1569_s21, 3  ;;  %s1182_s23 = sshll.u32 %s382_s27, 3 }
  0x21   : > { %s1733_s30 = scalar_select %p47_p12, %s1561_s19, %s49_s16  }
  0x22   : > { %p1735_p0 = pnand %p1271_p11, %p58_p9  ;;  %s402_s17 = sand.u32 1, %s1573_s22  }
  0x23   : > { %1930 = sst [smem:[#allocation17_spill]] %s1733_s30  ;;  %s406_s15 = scalar_lea.vmem [#allocation4], %s1182_s23 }
  0x24   : > { %s1932_s1 = sld [smem:[#allocation18_spill]]  ;;  %s414_s11 = sshll.u32 %s406_s15, 4  ;;  %s415_s11 = int_to_ptr.vmem [resolvable:$true] %s414_s11 }
  0x25   : > { %s1933_s9 = sld [smem:[#allocation23_spill]]  ;;  %s403_s10 = scalar_lea.sflag [#allocation5], %s402_s17 }
  0x26   : > { %s1578_s20 = smov [#allocation9]   ;;  %s1934_s14 = smov 4  }
  0x27   : > { %s365_s6 = sshll.u32 %s1578_s20, 4  ;;  %s1935_s25 = smov 64   ;;  %s366_s6 = int_to_ptr.vmem [resolvable:$true] %s365_s6 }
  0x28   : > { %s391_s30 = scalar_lea.hbm %s1894_s0, %s1730_s29  ;;  %s386_s16 = scalar_lea.vmem [#allocation2], %s1182_s23 }
  0x29   : > { %s430_s12 = scalar_lea.hbm %s1896_s2, %s1730_s29  ;;  %s425_s17 = scalar_lea.vmem [#allocation6], %s1182_s23 }
  0x2a   : > { %s410_s5 = scalar_lea.hbm %s1932_s1, %s1730_s29  ;;  %s395_s1 = sshll.u32 %s386_s16, 4  ;;  %s396_s1 = int_to_ptr.vmem [resolvable:$true] %s395_s1 }
  0x2b   : > { %s412_s21 = sshll.u32 %s410_s5, 4  ;;  %s363_s19 = sshll.u32 %s1933_s9, 4  ;;  %s413_s21 = int_to_ptr.hbm [resolvable:$true] %s412_s21  ;;  %s364_s19 = int_to_ptr.hbm [resolvable:$true] %s363_s19 }
  0x2c   : > { %1265 = dma.hbm_to_vmem [thread:$0]  (!%p1735_p0), %s413_s21, 128, %s415_s11, %s403_s10  }
  0x2d   : > { %1258 = dma.hbm_to_vmem [thread:$0]  (!%p1701_p5), %s364_s19, 256, %s366_s6, [#allocation8], %s1935_s25, %s1935_s25, %s1934_s14  }
  0x2e   : > { %s393_s9 = sshll.u32 %s391_s30, 4  ;;  %s383_s11 = scalar_lea.sflag [#allocation3], %s382_s27  ;;  %s394_s9 = int_to_ptr.hbm [resolvable:$true] %s393_s9 }
  0x2f   : > { %1262 = dma.hbm_to_vmem [thread:$0]  (!%p1735_p0), %s394_s9, 128, %s396_s1, %s383_s11  }
  0x30   : > { %s434_s8 = sshll.u32 %s425_s17, 4  ;;  %s432_s4 = sshll.u32 %s430_s12, 4  ;;  %s435_s8 = int_to_ptr.vmem [resolvable:$true] %s434_s8  ;;  %s433_s4 = int_to_ptr.hbm [resolvable:$true] %s432_s4 }
  0x31   : > { %1268 = dma.hbm_to_vmem [thread:$0]  (!%p1735_p0), %s433_s4, 128, %s435_s8, %s403_s10  }
  0x32   : > { %443 = sbr.rel (%p1693_p3) target bundleno = 1687 (0x697), region = 64  ;;  %s445_s6 = sand.u32 (!%p1693_p3), 1, %s1557_s18  }
  0x33   : > { %s1769_s19 = sshll.u32 (!%p1693_p3), %s445_s6, 3  ;;  %s446_s1 = scalar_lea.sflag (!%p1693_p3), [#allocation3], %s445_s6 }
  0x34   : > { %s449_s9 = scalar_lea.vmem (!%p1693_p3), [#allocation2], %s1769_s19 }
  0x37   : > { %1540 = dma.done.wait (%p1724_p13), %s446_s1, 128  }
  0x38   : > { %1542 = vsyncadd (%p1724_p13), %s446_s1, 4294967168  ;;  %s1936_s23 = sadd.s32 4294967295, %s1573_s22   ;;  %s459_s10 = scalar_lea.vmem [#allocation4], %s1769_s19 }
  0x39   : > { %s455_s4 = sand.u32 1, %s1936_s23  }
  0x3a   : > { %s456_s8 = scalar_lea.sflag [#allocation5], %s455_s4 }
  0x3b   : > { %1544 = dma.done.wait (%p1724_p13), %s456_s8, 256  }
  0x3c   : > { %1546 = vsyncadd (%p1724_p13), %s456_s8, 4294967040  ;;  %s469_s28 = scalar_lea.vmem [#allocation6], %s1769_s19 }
  0x3d   : > { %1548 = dma.done.wait (%p1685_p1), [#allocation8], 512  }
  0x3e   : > { %1550 = vsyncadd (%p1685_p1), [#allocation8], 4294966784  ;;  %vm543_vm0 = vcmask 261120   ;;  %v542_v0 = vld [vmem:[%s459_s10] sm:$0xff]  ;;  %v1789_v2 = vld [vmem:[%s449_s9] sm:$0xff]  ;;  %v1579_v4 = vmov 32.0  }
  0x3f   : > { %v582_v1 = vsel %vm543_vm0, %v542_v0, 0.0  ;;  %v544_v3 = vsel %vm543_vm0, %v1789_v2, 0.0  ;;  %1343 = vrcp.f32 %v1579_v4  ;;  %v1235_v21 = vld [vmem:[%s1901_s7 + $0x8] sm:$0xff]  ;;  %v1234_v22 = vld [vmem:[%s1901_s7] sm:$0xff]  ;;  %v1233_v23 = vld [vmem:[#allocation7 + $0x8] sm:$0xff]  ;;  %s1937_s15 = sld [smem:[#allocation19_spill]] }
  0x40   : > { %583 = vadd.xlane.f32.xlu0 %v582_v1  ;;  %672 = vmatpush.bf16.msra.mxu1 %v1235_v21  ;;  %v1232_v25 = vld [vmem:[#allocation7] sm:$0xff]  ;;  %v1338_v39 = vld [vmem:[%s1897_s3] ss:$0 sm:$0xff]  ;;  %s1938_s11 = sld [smem:[#allocation22_spill]]  ;;  %vm688_vm8 = vcmask 64512   ;;  %s1580_s17 = smov 120  }
  0x41   : > { %636 = vmatpush.bf16.msra.mxu0 %v1233_v23  ;;  %s1939_s12 = sld [smem:[#allocation21_spill]]  ;;  %s1581_s6 = smov 96   ;;  %vm743_vm9 = vcmask 1043456  }
  0x42   : > { %s1582_s1 = smov 112   ;;  %s1583_s9 = smov 104  }
  0x43   : > { %s1585_s19 = smov 80   ;;  %s1586_s23 = smov 88  }
  0x44   : > { %673 = vmatpush.bf16.msra.mxu1 %v1234_v22  ;;  %s1587_s4 = smov 72   ;;  %s1588_s8 = smov 16  }
  0x45   : > { %v1344_v5 = vpop.eup %1343  ;;  %637 = vmatpush.bf16.msra.mxu0 %v1232_v25  ;;  %v1339_v42 = vld [vmem:[%s1937_s15] ss:$0 sm:$0xff]  ;;  %s1589_s10 = smov 8   ;;  %s1940_s24 = sld [smem:[#allocation14_spill]] }
  0x46   : > { %v548_v6 = vmul.f32 32.0, %v1344_v5  ;;  %vm552_vm1 = vweird.f32 %v1344_v5  ;;  %v1340_v55 = vld [vmem:[%s1938_s11] ss:$0 sm:$0xff]  ;;  %s1941_s29 = sld [smem:[#allocation24_spill]] }
  0x47   : > { %v1341_v61 = vld [vmem:[%s1939_s12] ss:$0 sm:$0xff]  ;;  %s1942_s5 = sld [smem:[#allocation25_spill]] }
  0x48   : > { %545 = vadd.xlane.f32.xlu0 %v544_v3  ;;  %v549_v7 = vsub.f32 1.0, %v548_v6 }
  0x4a   : > { %v550_v8 = vmul.f32 %v1344_v5, %v549_v7 }
  0x4b   : > { %p531_p1 = scmp.lt.s32.totalorder %s1940_s24, 1 }
  0x4c   : > { %v551_v9 = vadd.f32 %v1344_v5, %v550_v8 }
  0x4d   : > { %s1952_s24 = smov (!%p531_p1, %s1940_s24), 1 }
  0x4e   : > { %v553_v10 = vsel %vm552_vm1, %v1344_v5, %v551_v9  ;;  %s1194_s13 = sshll.u32 %s1952_s24, 3 }
  0x4f   : > { %s537_s15 = scalar_lea.vmem %s1942_s5, %s1194_s13 }
  0xb3   : > { %v584_v11 = vpop.xlane.xlu0 %583 }
  0xb4   : > { %v585_v12 = vmul.f32 %v584_v11, %v553_v10 }
  0xb6   : > { %v586_v13 = vsub.f32 %v542_v0, %v585_v12 }
  0xb8   : > { %v587_v14 = vmul.f32 %v586_v13, %v586_v13 }
  0xba   : > { %v588_v15 = vsel %vm543_vm0, %v587_v14, 0.0 }
  0xbb   : > { %589 = vadd.xlane.f32.xlu1 %v588_v15  ;;  %v546_v16 = vpop.xlane.xlu0 %545 }
  0xbc   : > { %v554_v17 = vmul.f32 %v553_v10, %v546_v16  ;;  %v1584_v16 = vmov 0.0  }
  0xbe   : > { %v555_v18 = vsub.f32 %v1789_v2, %v554_v17 }
  0xc0   : > { %v556_v19 = vmul.f32 %v555_v18, %v555_v18 }
  0xc2   : > { %v557_v20 = vsel %vm543_vm0, %v556_v19, 0.0 }
  0xc3   : > { %558 = vadd.xlane.f32.xlu1 %v557_v20 }
 0x12e   : > { %v590_v24 = vpop.xlane.xlu1 %589 }
 0x12f   : > { %v591_v26 = vmul.f32 %v590_v24, %v553_v10 }
 0x131   : > { %v592_v27 = vadd.f32 1e-06, %v591_v26 }
 0x133   : > { %1345 = vrsqrt.f32 %v592_v27  ;;  %vm599_vm3 = vweird.f32 %v592_v27 }
 0x136   : > { %v559_v28 = vpop.xlane.xlu1 %558 }
 0x137   : > { %v560_v29 = vmul.f32 %v559_v28, %v553_v10 }
 0x139   : > { %v1346_v30 = vpop.eup %1345  ;;  %v561_v31 = vadd.f32 1e-06, %v560_v29 }
 0x13a   : > { %v594_v32 = vmul.f32 %v1346_v30, %v592_v27  ;;  %vm600_vm2 = vweird.f32 %v1346_v30 }
 0x13b   : > { %1347 = vrsqrt.f32 %v561_v31  ;;  %vm601_vm4 = vmor %vm599_vm3, %vm600_vm2  ;;  %vm568_vm6 = vweird.f32 %v561_v31 }
 0x13c   : > { %v595_v33 = vmul.f32 %v1346_v30, %v594_v32 }
 0x13e   : > { %v596_v34 = vmul.f32 0.5, %v595_v33 }
 0x140   : > { %v597_v35 = vsub.f32 1.5, %v596_v34 }
 0x141   : > { %v1348_v36 = vpop.eup %1347 }
 0x142   : > { %v598_v37 = vmul.f32 %v1346_v30, %v597_v35  ;;  %v563_v38 = vmul.f32 %v1348_v36, %v561_v31  ;;  %vm569_vm5 = vweird.f32 %v1348_v36 }
 0x143   : > { %vm570_vm7 = vmor %vm568_vm6, %vm569_vm5 }
 0x144   : > { %v602_v40 = vsel %vm601_vm4, %v1346_v30, %v598_v37  ;;  %v564_v41 = vmul.f32 %v1348_v36, %v563_v38 }
 0x145   : > { %v603_v43 = vmul.f32 %v602_v40, %v586_v13  ;;  %v679_v13 = vld [vmem:[%s469_s28] sm:$0xff]  ;;  %s1590_s28 = smov 24  }
 0x146   : > { %v565_v44 = vmul.f32 0.5, %v564_v41  ;;  %vm684_vm10 = vcmp.eq.s32.totalorder %v679_v13, 0 }
 0x147   : > { %v604_v45 = vmul.f32 %v1338_v39, %v603_v43  ;;  %v1831_v17 = vsel %vm684_vm10, -1e+09, %v1584_v16 }
 0x148   : > { %v566_v46 = vsub.f32 1.5, %v565_v44 }
 0x149   : > { %v605_v47 = vadd.f32 %v1339_v42, %v604_v45 }
 0x14a   : > { %v567_v48 = vmul.f32 %v1348_v36, %v566_v46 }
 0x14b   : > { %v606_v49 = vpack.c.bf16 %v605_v47, %v605_v47 }
 0x14c   : > { %v571_v50 = vsel %vm570_vm7, %v1348_v36, %v567_v48 }
 0x14d   : > { %1212 = vmatmul.msk.bf16.vlgmr.msra.gmra.mxu1 %vm543_vm0, %v606_v49  ;;  %v572_v51 = vmul.f32 %v571_v50, %v555_v18 }
 0x14f   : > { %v576_v52 = vmul.f32 %v1338_v39, %v572_v51 }
 0x151   : > { %v580_v53 = vadd.f32 %v1339_v42, %v576_v52 }
 0x153   : > { %v581_v54 = vpack.c.bf16 %v580_v53, %v580_v53 }
 0x155   : > { %1203 = vmatmul.msk.bf16.vlgmr.msra.gmra.mxu0 %vm543_vm0, %v581_v54 }
 0x1ca   : > { %v675_v56 = vpop.f32.mrf.mxu1 }
 0x1cb   : > { %v676_v57 = vadd.f32 %v1340_v55, %v675_v56 }
 0x1cd   : > { %v687_v58 = vpack.c.bf16 %v676_v57, %v676_v57 }
 0x1cf   : > { %v736_v59 = vunpack.c.l.b16 %v687_v58  ;;  %v693_v60 = vsel %vm688_vm8, %v687_v58, 0 }
 0x1d0   : > { %702 = vmatpush.bf16.xpose.msra.mxu2 %v693_v60 }
 0x1d1   : > { %v1817_v62 = vpack.c.b16 %v736_v59, %v736_v59 }
 0x1d2   : > { %v639_v63 = vpop.f32.mrf.mxu0  ;;  %v677_v0 = vpop.f32.mrf.mxu1 }
 0x1d3   : > { %v640_v1 = vadd.f32 %v1341_v61, %v639_v63  ;;  %765 = vrot.lane.b32.xlu1 %v1817_v62, %s1580_s17  ;;  %738 = vrot.lane.b32.xlu0 %v1817_v62, %s1581_s6 }
 0x1d5   : > { %v686_v3 = vpack.c.bf16 %v640_v1, %v640_v1 }
 0x1d7   : > { %v761_v4 = vunpack.c.l.b16 %v686_v3  ;;  %1213 = vmatmul.msk.bf16.vlgmr.msra.gmra.mxu2 %vm688_vm8, %v686_v3 }
 0x1d9   : > { %v762_v5 = vpack.c.b16 %v761_v4, %v761_v4 }
 0x1da   : > { %v641_v6 = vpop.f32.mrf.mxu0 }
 0x1db   : > { %836 = vrot.lane.b32.xlu0 %v1817_v62, %s1582_s1  ;;  %834 = vrot.lane.b32.xlu1 %v762_v5, %s1582_s1 }
 0x1e3   : > { %905 = vrot.lane.b32.xlu0 %v762_v5, %s1583_s9 }
 0x245   : > { %v766_v7 = vpop.permute.xlu1 %765  ;;  %v739_v8 = vpop.permute.xlu0 %738 }
 0x246   : > { %v745_v9 = vsel %vm743_vm9, %v739_v8, 0  ;;  %v771_v10 = vsel %vm688_vm8, %v766_v7, 0 }
 0x247   : > { %754 = vmatpush.bf16.msra.mxu3 %v745_v9 }
 0x24b   : > { %780 = vmatpush.bf16.xpose.msrb.mxu3 %v771_v10 }
 0x24d   : > { %v837_v11 = vpop.permute.xlu0 %836  ;;  %v835_v14 = vpop.permute.xlu1 %834 }
 0x24e   : > { %v842_v12 = vsel %vm688_vm8, %v837_v11, 0 }
 0x24f   : > { %851 = vmatpush.bf16.xpose.msrb.mxu1 %v842_v12 }
 0x255   : > { %v906_v53 = vpop.permute.xlu0 %905 }
 0x256   : > { %1217 = vmatmul.msk.bf16.vlgmr.msrb.gmra.mxu1 %vm688_vm8, %v835_v14 }
 0x25a   : > { %v704_v15 = vpop.f32.mrf.mxu2 }
 0x25b   : > { %v708_v18 = vmul.f32 0.35355338, %v704_v15 }
 0x25d   : > { %v709_v19 = vadd.f32 %v708_v18, %v1831_v17 }
 0x25f   : > { %v710_v20 = vsel %vm688_vm8, %v709_v19, -inf }
 0x260   : > { %711 = vmax.xlane.f32.xlu2 %v710_v20 }
 0x262   : > { %v706_v21 = vpop.f32.mrf.mxu2 }
 0x2d3   : > { %v853_v22 = vpop.f32.mrf.mxu1  ;;  %v712_v23 = vpop.xlane.xlu2 %711 }
 0x2d4   : > { %v857_v24 = vmul.f32 0.35355338, %v853_v22  ;;  %v713_v25 = vsub.f32 %v709_v19, %v712_v23 }
 0x2d6   : > { %v714_v26 = vmul.f32 1.442695, %v713_v25  ;;  %v858_v27 = vadd.f32 %v857_v24, %v1831_v17 }
 0x2d8   : > { %1349 = vpow2.f32 %v714_v26  ;;  %v859_v28 = vsel %vm688_vm8, %v858_v27, -inf }
 0x2d9   : > { %860 = vmax.xlane.f32.xlu1 %v859_v28 }
 0x2db   : > { %v855_v29 = vpop.f32.mrf.mxu1 }
 0x2de   : > { %v1350_v30 = vpop.eup %1349 }
 0x2df   : > { %v716_v31 = vsel %vm688_vm8, %v1350_v30, 0.0 }
 0x2e0   : > { %717 = vadd.xlane.f32.xlu2 %v716_v31 }
 0x2f8   : > { %763 = vrot.lane.b32.xlu2 %v762_v5, %s1580_s17 }
 0x300   : > { %907 = vrot.lane.b32.xlu2 %v1817_v62, %s1583_s9 }
 0x34c   : > { %v861_v32 = vpop.xlane.xlu1 %860 }
 0x34d   : > { %v862_v33 = vsub.f32 %v858_v27, %v861_v32 }
 0x34f   : > { %v863_v34 = vmul.f32 1.442695, %v862_v33 }
 0x351   : > { %1351 = vpow2.f32 %v863_v34 }
 0x353   : > { %v718_v35 = vpop.xlane.xlu2 %717 }
 0x354   : > { %1353 = vrcp.f32 %v718_v35  ;;  %v730_v42 = vand.u32 2147483648, %v718_v35  ;;  %v728_v44 = vand.u32 2147483647, %v718_v35  ;;  %vm724_vm12 = vweird.f32 %v718_v35 }
 0x356   : > { %v731_v46 = vor.u32 1.1754944e-38, %v730_v42  ;;  %vm729_vm14 = vcmp.eq.f32.partialorder %v728_v44, 8.507059e+37 }
 0x357   : > { %v1352_v36 = vpop.eup %1351 }
 0x358   : > { %v865_v37 = vsel %vm688_vm8, %v1352_v36, 0.0 }
 0x359   : > { %866 = vadd.xlane.f32.xlu1 %v865_v37 }
 0x35a   : > { %v1354_v38 = vpop.eup %1353 }
 0x35b   : > { %v720_v39 = vmul.f32 %v1354_v38, %v718_v35  ;;  %v764_v40 = vpop.permute.xlu2 %763  ;;  %vm725_vm11 = vweird.f32 %v1354_v38 }
 0x35c   : > { %vm726_vm13 = vmor %vm724_vm12, %vm725_vm11 }
 0x35d   : > { %v721_v41 = vsub.f32 1.0, %v720_v39 }
 0x35f   : > { %v722_v43 = vmul.f32 %v1354_v38, %v721_v41 }
 0x361   : > { %v723_v45 = vadd.f32 %v1354_v38, %v722_v43 }
 0x363   : > { %v727_v47 = vsel %vm726_vm13, %v1354_v38, %v723_v45  ;;  %v908_v50 = vpop.permute.xlu2 %907 }
 0x364   : > { %v732_v48 = vsel %vm729_vm14, %v731_v46, %v727_v47  ;;  %v913_v52 = vsel %vm688_vm8, %v908_v50, 0  ;;  %vm991_vm14 = vcmask 195584  }
 0x365   : > { %v733_v49 = vmul.f32 %v1350_v30, %v732_v48 }
 0x367   : > { %v734_v51 = vpack.c.bf16 %v733_v49, %v733_v49 }
 0x369   : > { %1214 = vmatmul.msk.bf16.vlgmr.msra.gmra.mxu3 %vm688_vm8, %v734_v51 }
 0x36a   : > { %922 = vmatpush.bf16.xpose.msra.mxu3 %v913_v52 }
 0x372   : > { %884 = vrot.lane.b32.xlu1 %v1817_v62, %s1585_s19 }
 0x379   : > { %1215 = vmatmul.msk.bf16.vlgmr.msrb.gmra.mxu3 %vm688_vm8, %v764_v40 }
 0x389   : > { %1219 = vmatmul.msk.bf16.vlgmr.msra.gmra.mxu3 %vm688_vm8, %v906_v53 }
 0x3cc   : > { %v867_v54 = vpop.xlane.xlu1 %866 }
 0x3cd   : > { %1355 = vrcp.f32 %v867_v54  ;;  %v879_v60 = vand.u32 2147483648, %v867_v54  ;;  %vm873_vm1 = vweird.f32 %v867_v54  ;;  %v877_v61 = vand.u32 2147483647, %v867_v54 }
 0x3cf   : > { %v880_v0 = vor.u32 1.1754944e-38, %v879_v60  ;;  %vm878_vm3 = vcmp.eq.f32.partialorder %v877_v61, 8.507059e+37 }
 0x3d3   : > { %v1356_v55 = vpop.eup %1355 }
 0x3d4   : > { %v869_v56 = vmul.f32 %v1356_v55, %v867_v54  ;;  %vm874_vm15 = vweird.f32 %v1356_v55 }
 0x3d5   : > { %vm875_vm2 = vmor %vm873_vm1, %vm874_vm15 }
 0x3d6   : > { %v870_v57 = vsub.f32 1.0, %v869_v56 }
 0x3d8   : > { %v871_v58 = vmul.f32 %v1356_v55, %v870_v57 }
 0x3da   : > { %v872_v59 = vadd.f32 %v1356_v55, %v871_v58 }
 0x3dc   : > { %v876_v63 = vsel %vm875_vm2, %v1356_v55, %v872_v59 }
 0x3dd   : > { %v881_v1 = vsel %vm878_vm3, %v880_v0, %v876_v63 }
 0x3de   : > { %v882_v3 = vmul.f32 %v1352_v36, %v881_v1  ;;  %v1237_v1 = vld [vmem:[#allocation9 + $0x8] sm:$0xff] }
 0x3df   : > { %1015 = vmatpush.bf16.msra.mxu1 %v1237_v1 }
 0x3e0   : > { %v883_v6 = vpack.c.bf16 %v882_v3, %v882_v3  ;;  %v1236_v3 = vld [vmem:[#allocation9] sm:$0xff] }
 0x3e3   : > { %1016 = vmatpush.bf16.msra.mxu1 %v1236_v3 }
 0x3e4   : > { %v885_v4 = vpop.permute.xlu1 %884 }
 0x3e5   : > { %v890_v5 = vsel %vm743_vm9, %v885_v4, 0 }
 0x3e6   : > { %899 = vmatpush.bf16.msrb.mxu2 %v890_v5 }
 0x3e9   : > { %1218 = vmatmul.msk.bf16.vlgmr.msrb.gmra.mxu2 %vm688_vm8, %v883_v6 }
 0x3ec   : > { %v1849_v7 = vpop.f32.mrf.mxu3 }
 0x3f4   : > { %v758_v8 = vpop.f32.mrf.mxu3 }
 0x3fc   : > { %v782_v9 = vpop.f32.mrf.mxu3 }
 0x3fd   : > { %v786_v10 = vmul.f32 0.35355338, %v782_v9 }
 0x3ff   : > { %v787_v11 = vadd.f32 %v786_v10, %v1831_v17 }
 0x401   : > { %v788_v12 = vsel %vm688_vm8, %v787_v11, -inf }
 0x402   : > { %789 = vmax.xlane.f32.xlu2 %v788_v12  ;;  %v1342_v12 = vld [vmem:[%s1941_s29] ss:$0 sm:$0xff] }
 0x404   : > { %v784_v13 = vpop.f32.mrf.mxu3 }
 0x40c   : > { %v924_v14 = vpop.f32.mrf.mxu3 }
 0x40d   : > { %v928_v15 = vmul.f32 0.35355338, %v924_v14 }
 0x40f   : > { %v929_v16 = vadd.f32 %v928_v15, %v1831_v17 }
 0x411   : > { %v930_v18 = vsel %vm688_vm8, %v929_v16, -inf }
 0x412   : > { %931 = vmax.xlane.f32.xlu0 %v930_v18 }
 0x414   : > { %v926_v19 = vpop.f32.mrf.mxu3 }
 0x46c   : > { %v901_v20 = vpop.f32.mrf.mxu2 }
 0x474   : > { %v903_v21 = vpop.f32.mrf.mxu2 }
 0x475   : > { %v790_v22 = vpop.xlane.xlu2 %789 }
 0x476   : > { %v791_v23 = vsub.f32 %v787_v11, %v790_v22 }
 0x478   : > { %v792_v24 = vmul.f32 1.442695, %v791_v23 }
 0x47a   : > { %1357 = vpow2.f32 %v792_v24 }
 0x480   : > { %v1358_v25 = vpop.eup %1357 }
 0x481   : > { %v794_v26 = vsel %vm688_vm8, %v1358_v25, 0.0 }
 0x482   : > { %795 = vadd.xlane.f32.xlu2 %v794_v26 }
 0x485   : > { %v932_v27 = vpop.xlane.xlu0 %931 }
 0x486   : > { %v933_v28 = vsub.f32 %v929_v16, %v932_v27 }
 0x488   : > { %v934_v29 = vmul.f32 1.442695, %v933_v28 }
 0x48a   : > { %1359 = vpow2.f32 %v934_v29 }
 0x490   : > { %v1360_v30 = vpop.eup %1359 }
 0x491   : > { %v936_v17 = vsel %vm688_vm8, %v1360_v30, 0.0 }
 0x492   : > { %937 = vadd.xlane.f32.xlu0 %v936_v17 }
 0x49a   : > { %813 = vrot.lane.b32.xlu2 %v1817_v62, %s1586_s23 }
 0x4a6   : > { %955 = vrot.lane.b32.xlu0 %v1817_v62, %s1587_s4 }
 0x4ae   : > { %981 = vrot.lane.b32.xlu0 %v901_v20, %s1588_s8 }
 0x4f5   : > { %v796_v31 = vpop.xlane.xlu2 %795 }
 0x4f6   : > { %1361 = vrcp.f32 %v796_v31  ;;  %v808_v38 = vand.u32 2147483648, %v796_v31  ;;  %v806_v39 = vand.u32 2147483647, %v796_v31  ;;  %vm802_vm5 = vweird.f32 %v796_v31 }
 0x4f8   : > { %v809_v41 = vor.u32 1.1754944e-38, %v808_v38  ;;  %vm807_vm7 = vcmp.eq.f32.partialorder %v806_v39, 8.507059e+37 }
 0x4fc   : > { %v1362_v32 = vpop.eup %1361 }
 0x4fd   : > { %v798_v33 = vmul.f32 %v1362_v32, %v796_v31  ;;  %v814_v34 = vpop.permute.xlu2 %813  ;;  %vm803_vm4 = vweird.f32 %v1362_v32 }
 0x4fe   : > { %v819_v35 = vsel %vm743_vm9, %v814_v34, 0  ;;  %vm804_vm6 = vmor %vm802_vm5, %vm803_vm4 }
 0x4ff   : > { %v799_v36 = vsub.f32 1.0, %v798_v33  ;;  %828 = vmatpush.bf16.msrb.mxu0 %v819_v35 }
 0x501   : > { %v800_v37 = vmul.f32 %v1362_v32, %v799_v36 }
 0x503   : > { %v801_v40 = vadd.f32 %v1362_v32, %v800_v37 }
 0x505   : > { %v938_v62 = vpop.xlane.xlu0 %937  ;;  %v805_v42 = vsel %vm804_vm6, %v1362_v32, %v801_v40 }
 0x506   : > { %1363 = vrcp.f32 %v938_v62  ;;  %v810_v43 = vsel %vm807_vm7, %v809_v41, %v805_v42  ;;  %v950_v49 = vand.u32 2147483648, %v938_v62  ;;  %v948_v51 = vand.u32 2147483647, %v938_v62 }
 0x507   : > { %v811_v44 = vmul.f32 %v1358_v25, %v810_v43  ;;  %vm944_vm11 = vweird.f32 %v938_v62 }
 0x508   : > { %v951_v53 = vor.u32 1.1754944e-38, %v950_v49  ;;  %vm949_vm13 = vcmp.eq.f32.partialorder %v948_v51, 8.507059e+37 }
 0x509   : > { %v812_v45 = vpack.c.bf16 %v811_v44, %v811_v44 }
 0x50b   : > { %1216 = vmatmul.msk.bf16.vlgmr.msrb.gmra.mxu0 %vm688_vm8, %v812_v45 }
 0x50c   : > { %v1364_v46 = vpop.eup %1363 }
 0x50d   : > { %v940_v47 = vmul.f32 %v1364_v46, %v938_v62  ;;  %vm945_vm10 = vweird.f32 %v1364_v46 }
 0x50e   : > { %vm946_vm12 = vmor %vm944_vm11, %vm945_vm10 }
 0x50f   : > { %v941_v48 = vsub.f32 1.0, %v940_v47 }
 0x511   : > { %v942_v50 = vmul.f32 %v1364_v46, %v941_v48 }
 0x513   : > { %v943_v52 = vadd.f32 %v1364_v46, %v942_v50 }
 0x515   : > { %v947_v54 = vsel %vm946_vm12, %v1364_v46, %v943_v52 }
 0x516   : > { %v952_v55 = vsel %vm949_vm13, %v951_v53, %v947_v54 }
 0x517   : > { %v953_v56 = vmul.f32 %v1360_v30, %v952_v55 }
 0x518   : > { %v956_v57 = vpop.permute.xlu0 %955 }
 0x519   : > { %v961_v58 = vsel %vm743_vm9, %v956_v57, 0  ;;  %v954_v59 = vpack.c.bf16 %v953_v56, %v953_v56  ;;  %vm989_vm9 = vcmask 130048  }
 0x51a   : > { %970 = vmatpush.bf16.msra.mxu0 %v961_v58 }
 0x51d   : > { %1220 = vmatmul.msk.bf16.vlgmr.msra.gmra.mxu0 %vm688_vm8, %v954_v59 }
 0x520   : > { %v982_v6 = vpop.permute.xlu0 %981 }
 0x588   : > { %v830_v60 = vpop.f32.mrf.mxu0 }
 0x589   : > { %977 = vrot.lane.b32.xlu2 %v830_v60, %s1589_s10 }
 0x590   : > { %v832_v61 = vpop.f32.mrf.mxu0 }
 0x59a   : > { %v972_v63 = vpop.f32.mrf.mxu0 }
 0x59b   : > { %985 = vrot.lane.b32.xlu1 %v972_v63, %s1590_s28 }
 0x5a2   : > { %v974_v0 = vpop.f32.mrf.mxu0 }
 0x5e3   : > { %v978_v4 = vpop.permute.xlu2 %977 }
 0x5e4   : > { %v988_v5 = vsel %vm688_vm8, %v1849_v7, %v978_v4 }
 0x5e5   : > { %v990_v9 = vsel %vm989_vm9, %v988_v5, %v982_v6 }
 0x60d   : > { %v986_v8 = vpop.permute.xlu1 %985 }
 0x60e   : > { %v992_v10 = vsel %vm991_vm14, %v990_v9, %v986_v8 }
 0x60f   : > { %v993_v11 = vpack.c.bf16 %v992_v10, %v992_v10 }
 0x611   : > { %1229 = vmatmul.msk.bf16.vlgmr.msra.gmra.mxu1 %vm543_vm0, %v993_v11 }
 0x68e   : > { %v1018_v13 = vpop.f32.mrf.mxu1 }
 0x68f   : > { %v1022_v14 = vadd.f32 %v1018_v13, %v1789_v2 }
 0x691   : > { %v1027_v7 = vadd.f32 %v1342_v12, %v1022_v14 }
 0x693   : > { %1028 = vst.msk [vmem:[%s537_s15] sm:$0xff] %vm543_vm0, %v1027_v7 }
 0x696   : > { %v1020_v15 = vpop.f32.mrf.mxu1 }
 0x697 PF: > { %s28_s22 = sadd.s32 1, %s1573_s22   ;;  %s1943_s30 = sld [smem:[#allocation13_spill]] }
 0x698   : > { %p25_p2 = scmp.ge.s32.totalorder %s28_s22, 4   ;;  %s1944_s19 = sld [smem:[#allocation17_spill]] }
 0x699   : > { %s1945_s20 = sld [smem:[#allocation15_spill]]  ;;  %s1947_s17 = smov %s1557_s18 }
 0x69a   : > { %s1946_s21 = sld [smem:[#allocation16_spill]]  ;;  %27 = sbr.rel (!%p25_p2) target bundleno = 16 (0x10), region = 136 }
 0x69d   : > { %s1948_s18 = smov %s1943_s30 }
 0x69f   :  { %1054 = vsyncpa [#allocation3], 1 }
 0x6a0   :  { %1056 = vsyncpa [#allocation3 + $0x1], 1 }
 0x6a1   :  { %1057 = vsyncpa [#allocation5], 1 }
 0x6a2   :  { %1059 = vsyncpa [#allocation5 + $0x1], 1 }
 0x6a3   :  { %1060 = vsyncpa [#allocation8], 1 }

</bundles_post_ra>
